<compile_context>
chip_gen: v5e
topology: v5e:2x2
jax: 0.10.0
libtpu: 0.0.40
codegen_flags: <defaults>
</compile_context>

<pallas_src>
import math
from functools import partial

import jax
import jax.numpy as jnp
from jax.experimental import pallas as pl
from jax.experimental.pallas import tpu as pltpu  # noqa: F401  (TPU backend)


# ------------------------------ model config -------------------------------

VOCAB = 100
MAX_POS = 16
HIDDEN = 32
HEADS = 4
HEAD_DIM = HIDDEN // HEADS
INTERMEDIATE = 64
LAYERS = 2


# --------------------------- fused Pallas kernel ----------------------------

def _bert_encoder_kernel(
    x_ref, bias_ref, pool_ref,
    emb_g_ref, emb_b_ref,
    wqkv_ref, bqkv_ref, wo_ref, bo_ref,
    ln1_g_ref, ln1_b_ref,
    w1_ref, b1_ref, w2_ref, b2_ref,
    ln2_g_ref, ln2_b_ref,
    hid_ref, pooled_ref,
    *, layers, heads, head_dim, scale,
):
    """Whole encoder in one invocation.

    x_ref:    (M, H)  summed embeddings (M = B*S)
    bias_ref: (M, M)  additive attention bias (block-diag batch mask + key mask)
    pool_ref: (B, M)  mean-over-seq pooling matrix (1/S on own-batch columns)
    weights:  stacked over the layer axis, indexed with a static Python int.
    outputs:  hid_ref (M, H) last hidden state, pooled_ref (B, H) mean pool.
    """
    H = heads * head_dim

    def ln(x, g, b):
        mu = jnp.mean(x, axis=-1, keepdims=True)
        d = x - mu
        var = jnp.mean(d * d, axis=-1, keepdims=True)
        return d * jax.lax.rsqrt(var + 1e-12) * g + b

    h = ln(x_ref[...], emb_g_ref[...], emb_b_ref[...])
    bias = bias_ref[...]

    for l in range(layers):                      # static unroll (LAYERS = 2)
        # ---- fused Q/K/V projection: one (M,H) @ (H,3H) matmul ----
        qkv = jnp.dot(h, wqkv_ref[l], preferred_element_type=jnp.float32) + bqkv_ref[l]
        q = qkv[:, 0:H]
        k = qkv[:, H:2 * H]
        v = qkv[:, 2 * H:3 * H]

        # ---- multi-head attention on the contiguous (M, H) layout ----
        ctx_parts = []
        for hd in range(heads):                  # static unroll (HEADS = 4)
            sl = slice(hd * head_dim, (hd + 1) * head_dim)
            qh, kh, vh = q[:, sl], k[:, sl], v[:, sl]
            # scores over all M rows; cross-batch pairs killed by the bias.
            s = jax.lax.dot_general(qh, kh, (((1,), (1,)), ((), ())),
                                    preferred_element_type=jnp.float32)
            s = s * scale + bias
            s = s - jnp.max(s, axis=-1, keepdims=True)
            p = jnp.exp(s)
            p = p * pl.reciprocal(jnp.sum(p, axis=-1, keepdims=True), approx=True)
            ctx_parts.append(jnp.dot(p, vh, preferred_element_type=jnp.float32))
        ctx = jnp.concatenate(ctx_parts, axis=-1)          # (M, H)

        # ---- output projection + residual + LN1 ----
        attn_out = jnp.dot(ctx, wo_ref[l], preferred_element_type=jnp.float32) + bo_ref[l]
        h = ln(h + attn_out, ln1_g_ref[l], ln1_b_ref[l])

        # ---- FFN (GELU) + residual + LN2 ----
        ff = jnp.dot(h, w1_ref[l], preferred_element_type=jnp.float32) + b1_ref[l]
        # TODO(synk): HF BERT uses exact erf-based GELU; tanh approximation here.
        c = jnp.float32(math.sqrt(2.0 / math.pi))
        ff = 0.5 * ff * (1.0 + jnp.tanh(c * (ff + 0.044715 * ff * ff * ff)))
        ff = jnp.dot(ff, w2_ref[l], preferred_element_type=jnp.float32) + b2_ref[l]
        h = ln(h + ff, ln2_g_ref[l], ln2_b_ref[l])

    hid_ref[...] = h.astype(hid_ref.dtype)
    # mean over seq folded in: (B, M) @ (M, H)
    pooled_ref[...] = jnp.dot(pool_ref[...], h,
                              preferred_element_type=jnp.float32).astype(pooled_ref.dtype)


def _run_fused_encoder(x, bias, pool, params):
    M, H = x.shape
    B = pool.shape[0]
    kernel = partial(_bert_encoder_kernel,
                     layers=LAYERS, heads=HEADS, head_dim=HEAD_DIM,
                     scale=1.0 / math.sqrt(HEAD_DIM))
    hid, pooled = pl.pallas_call(
        kernel,
        out_shape=(jax.ShapeDtypeStruct((M, H), jnp.float32),
                   jax.ShapeDtypeStruct((B, H), jnp.float32)),
    )(
        x, bias, pool,
        params["emb_ln_g"], params["emb_ln_b"],
        params["wqkv"], params["bqkv"], params["wo"], params["bo"],
        params["ln1_g"], params["ln1_b"],
        params["w1"], params["b1"], params["w2"], params["b2"],
        params["ln2_g"], params["ln2_b"],
    )
    return hid, pooled


# ------------------------------ params / glue -------------------------------

def init_params(key):
    scale = 0.02
    k = jax.random.split(key, 7)
    return {
        "word_emb": scale * jax.random.normal(k[0], (VOCAB, HIDDEN), jnp.float32),
        "pos_emb": scale * jax.random.normal(k[1], (MAX_POS, HIDDEN), jnp.float32),
        "type_emb": scale * jax.random.normal(k[2], (2, HIDDEN), jnp.float32),
        "emb_ln_g": jnp.ones((1, HIDDEN), jnp.float32),
        "emb_ln_b": jnp.zeros((1, HIDDEN), jnp.float32),
        # Q|K|V fused along the output axis -> one MXU matmul per layer.
        "wqkv": scale * jax.random.normal(k[3], (LAYERS, HIDDEN, 3 * HIDDEN), jnp.float32),
        "bqkv": jnp.zeros((LAYERS, 1, 3 * HIDDEN), jnp.float32),
        "wo": scale * jax.random.normal(k[4], (LAYERS, HIDDEN, HIDDEN), jnp.float32),
        "bo": jnp.zeros((LAYERS, 1, HIDDEN), jnp.float32),
        "ln1_g": jnp.ones((LAYERS, 1, HIDDEN), jnp.float32),
        "ln1_b": jnp.zeros((LAYERS, 1, HIDDEN), jnp.float32),
        "w1": scale * jax.random.normal(k[5], (LAYERS, HIDDEN, INTERMEDIATE), jnp.float32),
        "b1": jnp.zeros((LAYERS, 1, INTERMEDIATE), jnp.float32),
        "w2": scale * jax.random.normal(k[6], (LAYERS, INTERMEDIATE, HIDDEN), jnp.float32),
        "b2": jnp.zeros((LAYERS, 1, HIDDEN), jnp.float32),
        "ln2_g": jnp.ones((LAYERS, 1, HIDDEN), jnp.float32),
        "ln2_b": jnp.zeros((LAYERS, 1, HIDDEN), jnp.float32),
    }


@jax.jit
def bert_forward_core(params, input_ids, attention_mask):
    """input_ids, attention_mask: (B, S) int32 -> (S, B, H) bert_output, (B, H) pooled."""
    B, S = input_ids.shape
    M = B * S

    # Embedding gathers (glue; the LN runs inside the fused kernel).
    emb = (jnp.take(params["word_emb"], input_ids, axis=0)
           + params["pos_emb"][None, :S, :]
           + params["type_emb"][0][None, None, :])
    x = emb.reshape(M, HIDDEN).astype(jnp.float32)

    # Additive attention bias: block-diagonal over batches + HF-style key mask.
    batch_ids = jnp.repeat(jnp.arange(B), S)                       # (M,)
    same_batch = batch_ids[:, None] == batch_ids[None, :]          # (M, M)
    key_valid = (attention_mask.reshape(M) > 0)[None, :]           # (1, M)
    bias = jnp.where(same_batch,
                     jnp.where(key_valid, 0.0, -10000.0),
                     -1e9).astype(jnp.float32)

    # Mean-over-seq pooling matrix (matches torch `.mean(0)` over all S,
    # padding positions included).
    pool = jnp.where(batch_ids[None, :] == jnp.arange(B)[:, None],
                     1.0 / S, 0.0).astype(jnp.float32)             # (B, M)

    hid, pooled = _run_fused_encoder(x, bias, pool, params)
    last_hidden = hid.reshape(B, S, HIDDEN)
    bert_output = jnp.transpose(last_hidden, (1, 0, 2))            # (S, B, H)
    return bert_output, pooled


def bert_encoder_seq_forward(params, input_seqs, input_lengths, bert_encoding):
    """Mirrors Bert_EncoderSeq.forward: pad/stack encodings, run BERT,
    transpose(0,1) and mean over seq.  input_seqs / input_lengths are unused,
    exactly as in the original module."""
    length_max = max(int(e["input_ids"].squeeze().shape[0]) for e in bert_encoding)
    input_ids, attention_mask = [], []
    for e in bert_encoding:
        ids = e["input_ids"].squeeze().astype(jnp.int32)
        msk = e["attention_mask"].squeeze().astype(jnp.int32)
        pad = length_max - ids.shape[0]
        input_ids.append(jnp.concatenate([ids, jnp.zeros((pad,), jnp.int32)]))
        attention_mask.append(jnp.concatenate([msk, jnp.zeros((pad,), jnp.int32)]))
    input_ids = jnp.stack(input_ids, axis=0)            # (B, S)
    attention_mask = jnp.stack(attention_mask, axis=0)  # (B, S)

    bert_output, problem_output = bert_forward_core(params, input_ids, attention_mask)
    return [bert_output], problem_output


# ---------------------------------- main -----------------------------------

if __name__ == "__main__":
    key = jax.random.PRNGKey(0)
    kp, k1, k2 = jax.random.split(key, 3)
    params = init_params(kp)

    # Variable-length "tokenizer outputs", as in the torch module's forward.
    ids_a = jax.random.randint(k1, (6,), 1, VOCAB, dtype=jnp.int32)
    ids_b = jax.random.randint(k2, (8,), 1, VOCAB, dtype=jnp.int32)
    bert_encoding = [
        {"input_ids": ids_a, "attention_mask": jnp.ones((6,), jnp.int32)},
        {"input_ids": ids_b, "attention_mask": jnp.ones((8,), jnp.int32)},
    ]
    input_seqs = None       # unused by the forward path (BERT variant)
    input_lengths = [6, 8]  # unused by the forward path

    output_list, problem_output = bert_encoder_seq_forward(
        params, input_seqs, input_lengths, bert_encoding)

    jax.block_until_ready(output_list[0])
    jax.block_until_ready(problem_output)

    assert output_list[0].shape == (8, 2, HIDDEN), output_list[0].shape
    assert problem_output.shape == (2, HIDDEN), problem_output.shape
    assert jnp.isfinite(output_list[0]).all() and jnp.isfinite(problem_output).all()

    print("KERNEL_OK")
</pallas_src>

<mosaic_0001>
module attributes {stable_mosaic.version = 11 : i64} {
  func.func @_bert_encoder_kernel(%arg0: memref<16x32xf32, #tpu.memory_space<vmem>>, %arg1: memref<16x16xf32, #tpu.memory_space<vmem>>, %arg2: memref<2x16xf32, #tpu.memory_space<vmem>>, %arg3: memref<1x32xf32, #tpu.memory_space<vmem>>, %arg4: memref<1x32xf32, #tpu.memory_space<vmem>>, %arg5: memref<2x32x96xf32, #tpu.memory_space<vmem>>, %arg6: memref<2x1x96xf32, #tpu.memory_space<vmem>>, %arg7: memref<2x32x32xf32, #tpu.memory_space<vmem>>, %arg8: memref<2x1x32xf32, #tpu.memory_space<vmem>>, %arg9: memref<2x1x32xf32, #tpu.memory_space<vmem>>, %arg10: memref<2x1x32xf32, #tpu.memory_space<vmem>>, %arg11: memref<2x32x64xf32, #tpu.memory_space<vmem>>, %arg12: memref<2x1x64xf32, #tpu.memory_space<vmem>>, %arg13: memref<2x64x32xf32, #tpu.memory_space<vmem>>, %arg14: memref<2x1x32xf32, #tpu.memory_space<vmem>>, %arg15: memref<2x1x32xf32, #tpu.memory_space<vmem>>, %arg16: memref<2x1x32xf32, #tpu.memory_space<vmem>>, %arg17: memref<16x32xf32, #tpu.memory_space<vmem>>, %arg18: memref<2x32xf32, #tpu.memory_space<vmem>>) attributes {dimension_semantics = [], scalar_prefetch = 0 : i64, scratch_operands = 0 : i64, tpu.core_type = #tpu.core_type<tc>} {
    %c0 = arith.constant 0 : index
    %c0_0 = arith.constant 0 : index
    %0 = vector.load %arg0[%c0, %c0_0] : memref<16x32xf32, #tpu.memory_space<vmem>>, vector<16x32xf32>
    %c0_1 = arith.constant 0 : index
    %c0_2 = arith.constant 0 : index
    %1 = vector.load %arg3[%c0_1, %c0_2] : memref<1x32xf32, #tpu.memory_space<vmem>>, vector<1x32xf32>
    %c0_3 = arith.constant 0 : index
    %c0_4 = arith.constant 0 : index
    %2 = vector.load %arg4[%c0_3, %c0_4] : memref<1x32xf32, #tpu.memory_space<vmem>>, vector<1x32xf32>
    %cst = arith.constant dense<0.000000e+00> : vector<16xf32>
    %3 = vector.multi_reduction <add>, %0, %cst [1] : vector<16x32xf32> to vector<16xf32>
    %4 = vector.shape_cast %3 : vector<16xf32> to vector<16x1xf32>
    %cst_5 = arith.constant 3.200000e+01 : f32
    %5 = vector.broadcast %cst_5 : f32 to vector<16x1xf32>
    %6 = arith.divf %4, %5 : vector<16x1xf32>
    %7 = vector.broadcast %6 : vector<16x1xf32> to vector<16x32xf32>
    %8 = arith.subf %0, %7 : vector<16x32xf32>
    %9 = arith.mulf %8, %8 : vector<16x32xf32>
    %cst_6 = arith.constant dense<0.000000e+00> : vector<16xf32>
    %10 = vector.multi_reduction <add>, %9, %cst_6 [1] : vector<16x32xf32> to vector<16xf32>
    %11 = vector.shape_cast %10 : vector<16xf32> to vector<16x1xf32>
    %cst_7 = arith.constant 3.200000e+01 : f32
    %12 = vector.broadcast %cst_7 : f32 to vector<16x1xf32>
    %13 = arith.divf %11, %12 : vector<16x1xf32>
    %cst_8 = arith.constant 9.99999996E-13 : f32
    %14 = vector.broadcast %cst_8 : f32 to vector<16x1xf32>
    %15 = arith.addf %13, %14 : vector<16x1xf32>
    %16 = math.rsqrt %15 : vector<16x1xf32>
    %17 = vector.broadcast %16 : vector<16x1xf32> to vector<16x32xf32>
    %18 = arith.mulf %8, %17 : vector<16x32xf32>
    %19 = vector.broadcast %1 : vector<1x32xf32> to vector<16x32xf32>
    %20 = arith.mulf %18, %19 : vector<16x32xf32>
    %21 = vector.broadcast %2 : vector<1x32xf32> to vector<16x32xf32>
    %22 = arith.addf %20, %21 : vector<16x32xf32>
    %c0_9 = arith.constant 0 : index
    %c0_10 = arith.constant 0 : index
    %23 = vector.load %arg1[%c0_9, %c0_10] : memref<16x16xf32, #tpu.memory_space<vmem>>, vector<16x16xf32>
    %c0_11 = arith.constant 0 : index
    %c0_12 = arith.constant 0 : index
    %c0_13 = arith.constant 0 : index
    %24 = vector.load %arg5[%c0_11, %c0_12, %c0_13] : memref<2x32x96xf32, #tpu.memory_space<vmem>>, vector<1x32x96xf32>
    %25 = vector.shape_cast %24 : vector<1x32x96xf32> to vector<32x96xf32>
    %cst_14 = arith.constant dense<0.000000e+00> : vector<16x96xf32>
    %26 = tpu.matmul %22, %25, %cst_14 {dimension_numbers = #tpu.dot_dimension_numbers<[1], [0], [0], [1], [0, 0, 1, 1], [], []>} : vector<16x32xf32>, vector<32x96xf32>, vector<16x96xf32> -> vector<16x96xf32>
    %c0_15 = arith.constant 0 : index
    %c0_16 = arith.constant 0 : index
    %c0_17 = arith.constant 0 : index
    %27 = vector.load %arg6[%c0_15, %c0_16, %c0_17] : memref<2x1x96xf32, #tpu.memory_space<vmem>>, vector<1x1x96xf32>
    %28 = vector.shape_cast %27 : vector<1x1x96xf32> to vector<1x96xf32>
    %29 = vector.broadcast %28 : vector<1x96xf32> to vector<16x96xf32>
    %30 = arith.addf %26, %29 : vector<16x96xf32>
    %31 = vector.extract_strided_slice %30 {offsets = [0, 0], sizes = [16, 32], strides = [1, 1]} : vector<16x96xf32> to vector<16x32xf32>
    %32 = vector.extract_strided_slice %30 {offsets = [0, 32], sizes = [16, 32], strides = [1, 1]} : vector<16x96xf32> to vector<16x32xf32>
    %33 = vector.extract_strided_slice %30 {offsets = [0, 64], sizes = [16, 32], strides = [1, 1]} : vector<16x96xf32> to vector<16x32xf32>
    %34 = vector.extract_strided_slice %31 {offsets = [0, 0], sizes = [16, 8], strides = [1, 1]} : vector<16x32xf32> to vector<16x8xf32>
    %35 = vector.extract_strided_slice %32 {offsets = [0, 0], sizes = [16, 8], strides = [1, 1]} : vector<16x32xf32> to vector<16x8xf32>
    %36 = vector.extract_strided_slice %33 {offsets = [0, 0], sizes = [16, 8], strides = [1, 1]} : vector<16x32xf32> to vector<16x8xf32>
    %cst_18 = arith.constant dense<0.000000e+00> : vector<16x16xf32>
    %37 = tpu.matmul %34, %35, %cst_18 {dimension_numbers = #tpu.dot_dimension_numbers<[1], [1], [0], [0], [0, 0, 1, 0], [], []>} : vector<16x8xf32>, vector<16x8xf32>, vector<16x16xf32> -> vector<16x16xf32>
    %cst_19 = arith.constant 0.353553385 : f32
    %38 = vector.broadcast %cst_19 : f32 to vector<16x16xf32>
    %39 = arith.mulf %37, %38 : vector<16x16xf32>
    %40 = arith.addf %39, %23 : vector<16x16xf32>
    %cst_20 = arith.constant dense<0xFF800000> : vector<16xf32>
    %41 = vector.multi_reduction <maximumf>, %40, %cst_20 [1] : vector<16x16xf32> to vector<16xf32>
    %42 = vector.shape_cast %41 : vector<16xf32> to vector<16x1xf32>
    %43 = vector.broadcast %42 : vector<16x1xf32> to vector<16x16xf32>
    %44 = arith.subf %40, %43 : vector<16x16xf32>
    %45 = math.exp %44 : vector<16x16xf32>
    %cst_21 = arith.constant dense<0.000000e+00> : vector<16xf32>
    %46 = vector.multi_reduction <add>, %45, %cst_21 [1] : vector<16x16xf32> to vector<16xf32>
    %47 = vector.shape_cast %46 : vector<16xf32> to vector<16x1xf32>
    %48 = tpu.reciprocal %47 {approx = true} : vector<16x1xf32> -> vector<16x1xf32>
    %49 = vector.broadcast %48 : vector<16x1xf32> to vector<16x16xf32>
    %50 = arith.mulf %45, %49 : vector<16x16xf32>
    %cst_22 = arith.constant dense<0.000000e+00> : vector<16x8xf32>
    %51 = tpu.matmul %50, %36, %cst_22 {dimension_numbers = #tpu.dot_dimension_numbers<[1], [0], [0], [1], [0, 0, 1, 1], [], []>} : vector<16x16xf32>, vector<16x8xf32>, vector<16x8xf32> -> vector<16x8xf32>
    %52 = vector.extract_strided_slice %31 {offsets = [0, 8], sizes = [16, 8], strides = [1, 1]} : vector<16x32xf32> to vector<16x8xf32>
    %53 = vector.extract_strided_slice %32 {offsets = [0, 8], sizes = [16, 8], strides = [1, 1]} : vector<16x32xf32> to vector<16x8xf32>
    %54 = vector.extract_strided_slice %33 {offsets = [0, 8], sizes = [16, 8], strides = [1, 1]} : vector<16x32xf32> to vector<16x8xf32>
    %cst_23 = arith.constant dense<0.000000e+00> : vector<16x16xf32>
    %55 = tpu.matmul %52, %53, %cst_23 {dimension_numbers = #tpu.dot_dimension_numbers<[1], [1], [0], [0], [0, 0, 1, 0], [], []>} : vector<16x8xf32>, vector<16x8xf32>, vector<16x16xf32> -> vector<16x16xf32>
    %cst_24 = arith.constant 0.353553385 : f32
    %56 = vector.broadcast %cst_24 : f32 to vector<16x16xf32>
    %57 = arith.mulf %55, %56 : vector<16x16xf32>
    %58 = arith.addf %57, %23 : vector<16x16xf32>
    %cst_25 = arith.constant dense<0xFF800000> : vector<16xf32>
    %59 = vector.multi_reduction <maximumf>, %58, %cst_25 [1] : vector<16x16xf32> to vector<16xf32>
    %60 = vector.shape_cast %59 : vector<16xf32> to vector<16x1xf32>
    %61 = vector.broadcast %60 : vector<16x1xf32> to vector<16x16xf32>
    %62 = arith.subf %58, %61 : vector<16x16xf32>
    %63 = math.exp %62 : vector<16x16xf32>
    %cst_26 = arith.constant dense<0.000000e+00> : vector<16xf32>
    %64 = vector.multi_reduction <add>, %63, %cst_26 [1] : vector<16x16xf32> to vector<16xf32>
    %65 = vector.shape_cast %64 : vector<16xf32> to vector<16x1xf32>
    %66 = tpu.reciprocal %65 {approx = true} : vector<16x1xf32> -> vector<16x1xf32>
    %67 = vector.broadcast %66 : vector<16x1xf32> to vector<16x16xf32>
    %68 = arith.mulf %63, %67 : vector<16x16xf32>
    %cst_27 = arith.constant dense<0.000000e+00> : vector<16x8xf32>
    %69 = tpu.matmul %68, %54, %cst_27 {dimension_numbers = #tpu.dot_dimension_numbers<[1], [0], [0], [1], [0, 0, 1, 1], [], []>} : vector<16x16xf32>, vector<16x8xf32>, vector<16x8xf32> -> vector<16x8xf32>
    %70 = vector.extract_strided_slice %31 {offsets = [0, 16], sizes = [16, 8], strides = [1, 1]} : vector<16x32xf32> to vector<16x8xf32>
    %71 = vector.extract_strided_slice %32 {offsets = [0, 16], sizes = [16, 8], strides = [1, 1]} : vector<16x32xf32> to vector<16x8xf32>
    %72 = vector.extract_strided_slice %33 {offsets = [0, 16], sizes = [16, 8], strides = [1, 1]} : vector<16x32xf32> to vector<16x8xf32>
    %cst_28 = arith.constant dense<0.000000e+00> : vector<16x16xf32>
    %73 = tpu.matmul %70, %71, %cst_28 {dimension_numbers = #tpu.dot_dimension_numbers<[1], [1], [0], [0], [0, 0, 1, 0], [], []>} : vector<16x8xf32>, vector<16x8xf32>, vector<16x16xf32> -> vector<16x16xf32>
    %cst_29 = arith.constant 0.353553385 : f32
    %74 = vector.broadcast %cst_29 : f32 to vector<16x16xf32>
    %75 = arith.mulf %73, %74 : vector<16x16xf32>
    %76 = arith.addf %75, %23 : vector<16x16xf32>
    %cst_30 = arith.constant dense<0xFF800000> : vector<16xf32>
    %77 = vector.multi_reduction <maximumf>, %76, %cst_30 [1] : vector<16x16xf32> to vector<16xf32>
    %78 = vector.shape_cast %77 : vector<16xf32> to vector<16x1xf32>
    %79 = vector.broadcast %78 : vector<16x1xf32> to vector<16x16xf32>
    %80 = arith.subf %76, %79 : vector<16x16xf32>
    %81 = math.exp %80 : vector<16x16xf32>
    %cst_31 = arith.constant dense<0.000000e+00> : vector<16xf32>
    %82 = vector.multi_reduction <add>, %81, %cst_31 [1] : vector<16x16xf32> to vector<16xf32>
    %83 = vector.shape_cast %82 : vector<16xf32> to vector<16x1xf32>
    %84 = tpu.reciprocal %83 {approx = true} : vector<16x1xf32> -> vector<16x1xf32>
    %85 = vector.broadcast %84 : vector<16x1xf32> to vector<16x16xf32>
    %86 = arith.mulf %81, %85 : vector<16x16xf32>
    %cst_32 = arith.constant dense<0.000000e+00> : vector<16x8xf32>
    %87 = tpu.matmul %86, %72, %cst_32 {dimension_numbers = #tpu.dot_dimension_numbers<[1], [0], [0], [1], [0, 0, 1, 1], [], []>} : vector<16x16xf32>, vector<16x8xf32>, vector<16x8xf32> -> vector<16x8xf32>
    %88 = vector.extract_strided_slice %31 {offsets = [0, 24], sizes = [16, 8], strides = [1, 1]} : vector<16x32xf32> to vector<16x8xf32>
    %89 = vector.extract_strided_slice %32 {offsets = [0, 24], sizes = [16, 8], strides = [1, 1]} : vector<16x32xf32> to vector<16x8xf32>
    %90 = vector.extract_strided_slice %33 {offsets = [0, 24], sizes = [16, 8], strides = [1, 1]} : vector<16x32xf32> to vector<16x8xf32>
    %cst_33 = arith.constant dense<0.000000e+00> : vector<16x16xf32>
    %91 = tpu.matmul %88, %89, %cst_33 {dimension_numbers = #tpu.dot_dimension_numbers<[1], [1], [0], [0], [0, 0, 1, 0], [], []>} : vector<16x8xf32>, vector<16x8xf32>, vector<16x16xf32> -> vector<16x16xf32>
    %cst_34 = arith.constant 0.353553385 : f32
    %92 = vector.broadcast %cst_34 : f32 to vector<16x16xf32>
    %93 = arith.mulf %91, %92 : vector<16x16xf32>
    %94 = arith.addf %93, %23 : vector<16x16xf32>
    %cst_35 = arith.constant dense<0xFF800000> : vector<16xf32>
    %95 = vector.multi_reduction <maximumf>, %94, %cst_35 [1] : vector<16x16xf32> to vector<16xf32>
    %96 = vector.shape_cast %95 : vector<16xf32> to vector<16x1xf32>
    %97 = vector.broadcast %96 : vector<16x1xf32> to vector<16x16xf32>
    %98 = arith.subf %94, %97 : vector<16x16xf32>
    %99 = math.exp %98 : vector<16x16xf32>
    %cst_36 = arith.constant dense<0.000000e+00> : vector<16xf32>
    %100 = vector.multi_reduction <add>, %99, %cst_36 [1] : vector<16x16xf32> to vector<16xf32>
    %101 = vector.shape_cast %100 : vector<16xf32> to vector<16x1xf32>
    %102 = tpu.reciprocal %101 {approx = true} : vector<16x1xf32> -> vector<16x1xf32>
    %103 = vector.broadcast %102 : vector<16x1xf32> to vector<16x16xf32>
    %104 = arith.mulf %99, %103 : vector<16x16xf32>
    %cst_37 = arith.constant dense<0.000000e+00> : vector<16x8xf32>
    %105 = tpu.matmul %104, %90, %cst_37 {dimension_numbers = #tpu.dot_dimension_numbers<[1], [0], [0], [1], [0, 0, 1, 1], [], []>} : vector<16x16xf32>, vector<16x8xf32>, vector<16x8xf32> -> vector<16x8xf32>
    %106 = tpu.concatenate %51, %69, %87, %105 in 1 : vector<16x8xf32>, vector<16x8xf32>, vector<16x8xf32>, vector<16x8xf32> -> vector<16x32xf32>
    %c0_38 = arith.constant 0 : index
    %c0_39 = arith.constant 0 : index
    %c0_40 = arith.constant 0 : index
    %107 = vector.load %arg7[%c0_38, %c0_39, %c0_40] : memref<2x32x32xf32, #tpu.memory_space<vmem>>, vector<1x32x32xf32>
    %108 = vector.shape_cast %107 : vector<1x32x32xf32> to vector<32x32xf32>
    %cst_41 = arith.constant dense<0.000000e+00> : vector<16x32xf32>
    %109 = tpu.matmul %106, %108, %cst_41 {dimension_numbers = #tpu.dot_dimension_numbers<[1], [0], [0], [1], [0, 0, 1, 1], [], []>} : vector<16x32xf32>, vector<32x32xf32>, vector<16x32xf32> -> vector<16x32xf32>
    %c0_42 = arith.constant 0 : index
    %c0_43 = arith.constant 0 : index
    %c0_44 = arith.constant 0 : index
    %110 = vector.load %arg8[%c0_42, %c0_43, %c0_44] : memref<2x1x32xf32, #tpu.memory_space<vmem>>, vector<1x1x32xf32>
    %111 = vector.shape_cast %110 : vector<1x1x32xf32> to vector<1x32xf32>
    %112 = vector.broadcast %111 : vector<1x32xf32> to vector<16x32xf32>
    %113 = arith.addf %109, %112 : vector<16x32xf32>
    %114 = arith.addf %22, %113 : vector<16x32xf32>
    %c0_45 = arith.constant 0 : index
    %c0_46 = arith.constant 0 : index
    %c0_47 = arith.constant 0 : index
    %115 = vector.load %arg9[%c0_45, %c0_46, %c0_47] : memref<2x1x32xf32, #tpu.memory_space<vmem>>, vector<1x1x32xf32>
    %116 = vector.shape_cast %115 : vector<1x1x32xf32> to vector<1x32xf32>
    %c0_48 = arith.constant 0 : index
    %c0_49 = arith.constant 0 : index
    %c0_50 = arith.constant 0 : index
    %117 = vector.load %arg10[%c0_48, %c0_49, %c0_50] : memref<2x1x32xf32, #tpu.memory_space<vmem>>, vector<1x1x32xf32>
    %118 = vector.shape_cast %117 : vector<1x1x32xf32> to vector<1x32xf32>
    %cst_51 = arith.constant dense<0.000000e+00> : vector<16xf32>
    %119 = vector.multi_reduction <add>, %114, %cst_51 [1] : vector<16x32xf32> to vector<16xf32>
    %120 = vector.shape_cast %119 : vector<16xf32> to vector<16x1xf32>
    %cst_52 = arith.constant 3.200000e+01 : f32
    %121 = vector.broadcast %cst_52 : f32 to vector<16x1xf32>
    %122 = arith.divf %120, %121 : vector<16x1xf32>
    %123 = vector.broadcast %122 : vector<16x1xf32> to vector<16x32xf32>
    %124 = arith.subf %114, %123 : vector<16x32xf32>
    %125 = arith.mulf %124, %124 : vector<16x32xf32>
    %cst_53 = arith.constant dense<0.000000e+00> : vector<16xf32>
    %126 = vector.multi_reduction <add>, %125, %cst_53 [1] : vector<16x32xf32> to vector<16xf32>
    %127 = vector.shape_cast %126 : vector<16xf32> to vector<16x1xf32>
    %cst_54 = arith.constant 3.200000e+01 : f32
    %128 = vector.broadcast %cst_54 : f32 to vector<16x1xf32>
    %129 = arith.divf %127, %128 : vector<16x1xf32>
    %cst_55 = arith.constant 9.99999996E-13 : f32
    %130 = vector.broadcast %cst_55 : f32 to vector<16x1xf32>
    %131 = arith.addf %129, %130 : vector<16x1xf32>
    %132 = math.rsqrt %131 : vector<16x1xf32>
    %133 = vector.broadcast %132 : vector<16x1xf32> to vector<16x32xf32>
    %134 = arith.mulf %124, %133 : vector<16x32xf32>
    %135 = vector.broadcast %116 : vector<1x32xf32> to vector<16x32xf32>
    %136 = arith.mulf %134, %135 : vector<16x32xf32>
    %137 = vector.broadcast %118 : vector<1x32xf32> to vector<16x32xf32>
    %138 = arith.addf %136, %137 : vector<16x32xf32>
    %c0_56 = arith.constant 0 : index
    %c0_57 = arith.constant 0 : index
    %c0_58 = arith.constant 0 : index
    %139 = vector.load %arg11[%c0_56, %c0_57, %c0_58] : memref<2x32x64xf32, #tpu.memory_space<vmem>>, vector<1x32x64xf32>
    %140 = vector.shape_cast %139 : vector<1x32x64xf32> to vector<32x64xf32>
    %cst_59 = arith.constant dense<0.000000e+00> : vector<16x64xf32>
    %141 = tpu.matmul %138, %140, %cst_59 {dimension_numbers = #tpu.dot_dimension_numbers<[1], [0], [0], [1], [0, 0, 1, 1], [], []>} : vector<16x32xf32>, vector<32x64xf32>, vector<16x64xf32> -> vector<16x64xf32>
    %c0_60 = arith.constant 0 : index
    %c0_61 = arith.constant 0 : index
    %c0_62 = arith.constant 0 : index
    %142 = vector.load %arg12[%c0_60, %c0_61, %c0_62] : memref<2x1x64xf32, #tpu.memory_space<vmem>>, vector<1x1x64xf32>
    %143 = vector.shape_cast %142 : vector<1x1x64xf32> to vector<1x64xf32>
    %144 = vector.broadcast %143 : vector<1x64xf32> to vector<16x64xf32>
    %145 = arith.addf %141, %144 : vector<16x64xf32>
    %cst_63 = arith.constant 5.000000e-01 : f32
    %146 = vector.broadcast %cst_63 : f32 to vector<16x64xf32>
    %147 = arith.mulf %146, %145 : vector<16x64xf32>
    %cst_64 = arith.constant 4.471500e-02 : f32
    %148 = vector.broadcast %cst_64 : f32 to vector<16x64xf32>
    %149 = arith.mulf %148, %145 : vector<16x64xf32>
    %150 = arith.mulf %149, %145 : vector<16x64xf32>
    %151 = arith.mulf %150, %145 : vector<16x64xf32>
    %152 = arith.addf %145, %151 : vector<16x64xf32>
    %cst_65 = arith.constant 0.797884583 : f32
    %153 = vector.broadcast %cst_65 : f32 to vector<16x64xf32>
    %154 = arith.mulf %153, %152 : vector<16x64xf32>
    %155 = math.tanh %154 : vector<16x64xf32>
    %cst_66 = arith.constant 1.000000e+00 : f32
    %156 = vector.broadcast %cst_66 : f32 to vector<16x64xf32>
    %157 = arith.addf %156, %155 : vector<16x64xf32>
    %158 = arith.mulf %147, %157 : vector<16x64xf32>
    %c0_67 = arith.constant 0 : index
    %c0_68 = arith.constant 0 : index
    %c0_69 = arith.constant 0 : index
    %159 = vector.load %arg13[%c0_67, %c0_68, %c0_69] : memref<2x64x32xf32, #tpu.memory_space<vmem>>, vector<1x64x32xf32>
    %160 = vector.shape_cast %159 : vector<1x64x32xf32> to vector<64x32xf32>
    %cst_70 = arith.constant dense<0.000000e+00> : vector<16x32xf32>
    %161 = tpu.matmul %158, %160, %cst_70 {dimension_numbers = #tpu.dot_dimension_numbers<[1], [0], [0], [1], [0, 0, 1, 1], [], []>} : vector<16x64xf32>, vector<64x32xf32>, vector<16x32xf32> -> vector<16x32xf32>
    %c0_71 = arith.constant 0 : index
    %c0_72 = arith.constant 0 : index
    %c0_73 = arith.constant 0 : index
    %162 = vector.load %arg14[%c0_71, %c0_72, %c0_73] : memref<2x1x32xf32, #tpu.memory_space<vmem>>, vector<1x1x32xf32>
    %163 = vector.shape_cast %162 : vector<1x1x32xf32> to vector<1x32xf32>
    %164 = vector.broadcast %163 : vector<1x32xf32> to vector<16x32xf32>
    %165 = arith.addf %161, %164 : vector<16x32xf32>
    %166 = arith.addf %138, %165 : vector<16x32xf32>
    %c0_74 = arith.constant 0 : index
    %c0_75 = arith.constant 0 : index
    %c0_76 = arith.constant 0 : index
    %167 = vector.load %arg15[%c0_74, %c0_75, %c0_76] : memref<2x1x32xf32, #tpu.memory_space<vmem>>, vector<1x1x32xf32>
    %168 = vector.shape_cast %167 : vector<1x1x32xf32> to vector<1x32xf32>
    %c0_77 = arith.constant 0 : index
    %c0_78 = arith.constant 0 : index
    %c0_79 = arith.constant 0 : index
    %169 = vector.load %arg16[%c0_77, %c0_78, %c0_79] : memref<2x1x32xf32, #tpu.memory_space<vmem>>, vector<1x1x32xf32>
    %170 = vector.shape_cast %169 : vector<1x1x32xf32> to vector<1x32xf32>
    %cst_80 = arith.constant dense<0.000000e+00> : vector<16xf32>
    %171 = vector.multi_reduction <add>, %166, %cst_80 [1] : vector<16x32xf32> to vector<16xf32>
    %172 = vector.shape_cast %171 : vector<16xf32> to vector<16x1xf32>
    %cst_81 = arith.constant 3.200000e+01 : f32
    %173 = vector.broadcast %cst_81 : f32 to vector<16x1xf32>
    %174 = arith.divf %172, %173 : vector<16x1xf32>
    %175 = vector.broadcast %174 : vector<16x1xf32> to vector<16x32xf32>
    %176 = arith.subf %166, %175 : vector<16x32xf32>
    %177 = arith.mulf %176, %176 : vector<16x32xf32>
    %cst_82 = arith.constant dense<0.000000e+00> : vector<16xf32>
    %178 = vector.multi_reduction <add>, %177, %cst_82 [1] : vector<16x32xf32> to vector<16xf32>
    %179 = vector.shape_cast %178 : vector<16xf32> to vector<16x1xf32>
    %cst_83 = arith.constant 3.200000e+01 : f32
    %180 = vector.broadcast %cst_83 : f32 to vector<16x1xf32>
    %181 = arith.divf %179, %180 : vector<16x1xf32>
    %cst_84 = arith.constant 9.99999996E-13 : f32
    %182 = vector.broadcast %cst_84 : f32 to vector<16x1xf32>
    %183 = arith.addf %181, %182 : vector<16x1xf32>
    %184 = math.rsqrt %183 : vector<16x1xf32>
    %185 = vector.broadcast %184 : vector<16x1xf32> to vector<16x32xf32>
    %186 = arith.mulf %176, %185 : vector<16x32xf32>
    %187 = vector.broadcast %168 : vector<1x32xf32> to vector<16x32xf32>
    %188 = arith.mulf %186, %187 : vector<16x32xf32>
    %189 = vector.broadcast %170 : vector<1x32xf32> to vector<16x32xf32>
    %190 = arith.addf %188, %189 : vector<16x32xf32>
    %c1 = arith.constant 1 : index
    %c0_85 = arith.constant 0 : index
    %c0_86 = arith.constant 0 : index
    %191 = vector.load %arg5[%c1, %c0_85, %c0_86] : memref<2x32x96xf32, #tpu.memory_space<vmem>>, vector<1x32x96xf32>
    %192 = vector.shape_cast %191 : vector<1x32x96xf32> to vector<32x96xf32>
    %cst_87 = arith.constant dense<0.000000e+00> : vector<16x96xf32>
    %193 = tpu.matmul %190, %192, %cst_87 {dimension_numbers = #tpu.dot_dimension_numbers<[1], [0], [0], [1], [0, 0, 1, 1], [], []>} : vector<16x32xf32>, vector<32x96xf32>, vector<16x96xf32> -> vector<16x96xf32>
    %c1_88 = arith.constant 1 : index
    %c0_89 = arith.constant 0 : index
    %c0_90 = arith.constant 0 : index
    %194 = vector.load %arg6[%c1_88, %c0_89, %c0_90] : memref<2x1x96xf32, #tpu.memory_space<vmem>>, vector<1x1x96xf32>
    %195 = vector.shape_cast %194 : vector<1x1x96xf32> to vector<1x96xf32>
    %196 = vector.broadcast %195 : vector<1x96xf32> to vector<16x96xf32>
    %197 = arith.addf %193, %196 : vector<16x96xf32>
    %198 = vector.extract_strided_slice %197 {offsets = [0, 0], sizes = [16, 32], strides = [1, 1]} : vector<16x96xf32> to vector<16x32xf32>
    %199 = vector.extract_strided_slice %197 {offsets = [0, 32], sizes = [16, 32], strides = [1, 1]} : vector<16x96xf32> to vector<16x32xf32>
    %200 = vector.extract_strided_slice %197 {offsets = [0, 64], sizes = [16, 32], strides = [1, 1]} : vector<16x96xf32> to vector<16x32xf32>
    %201 = vector.extract_strided_slice %198 {offsets = [0, 0], sizes = [16, 8], strides = [1, 1]} : vector<16x32xf32> to vector<16x8xf32>
    %202 = vector.extract_strided_slice %199 {offsets = [0, 0], sizes = [16, 8], strides = [1, 1]} : vector<16x32xf32> to vector<16x8xf32>
    %203 = vector.extract_strided_slice %200 {offsets = [0, 0], sizes = [16, 8], strides = [1, 1]} : vector<16x32xf32> to vector<16x8xf32>
    %cst_91 = arith.constant dense<0.000000e+00> : vector<16x16xf32>
    %204 = tpu.matmul %201, %202, %cst_91 {dimension_numbers = #tpu.dot_dimension_numbers<[1], [1], [0], [0], [0, 0, 1, 0], [], []>} : vector<16x8xf32>, vector<16x8xf32>, vector<16x16xf32> -> vector<16x16xf32>
    %cst_92 = arith.constant 0.353553385 : f32
    %205 = vector.broadcast %cst_92 : f32 to vector<16x16xf32>
    %206 = arith.mulf %204, %205 : vector<16x16xf32>
    %207 = arith.addf %206, %23 : vector<16x16xf32>
    %cst_93 = arith.constant dense<0xFF800000> : vector<16xf32>
    %208 = vector.multi_reduction <maximumf>, %207, %cst_93 [1] : vector<16x16xf32> to vector<16xf32>
    %209 = vector.shape_cast %208 : vector<16xf32> to vector<16x1xf32>
    %210 = vector.broadcast %209 : vector<16x1xf32> to vector<16x16xf32>
    %211 = arith.subf %207, %210 : vector<16x16xf32>
    %212 = math.exp %211 : vector<16x16xf32>
    %cst_94 = arith.constant dense<0.000000e+00> : vector<16xf32>
    %213 = vector.multi_reduction <add>, %212, %cst_94 [1] : vector<16x16xf32> to vector<16xf32>
    %214 = vector.shape_cast %213 : vector<16xf32> to vector<16x1xf32>
    %215 = tpu.reciprocal %214 {approx = true} : vector<16x1xf32> -> vector<16x1xf32>
    %216 = vector.broadcast %215 : vector<16x1xf32> to vector<16x16xf32>
    %217 = arith.mulf %212, %216 : vector<16x16xf32>
    %cst_95 = arith.constant dense<0.000000e+00> : vector<16x8xf32>
    %218 = tpu.matmul %217, %203, %cst_95 {dimension_numbers = #tpu.dot_dimension_numbers<[1], [0], [0], [1], [0, 0, 1, 1], [], []>} : vector<16x16xf32>, vector<16x8xf32>, vector<16x8xf32> -> vector<16x8xf32>
    %219 = vector.extract_strided_slice %198 {offsets = [0, 8], sizes = [16, 8], strides = [1, 1]} : vector<16x32xf32> to vector<16x8xf32>
    %220 = vector.extract_strided_slice %199 {offsets = [0, 8], sizes = [16, 8], strides = [1, 1]} : vector<16x32xf32> to vector<16x8xf32>
    %221 = vector.extract_strided_slice %200 {offsets = [0, 8], sizes = [16, 8], strides = [1, 1]} : vector<16x32xf32> to vector<16x8xf32>
    %cst_96 = arith.constant dense<0.000000e+00> : vector<16x16xf32>
    %222 = tpu.matmul %219, %220, %cst_96 {dimension_numbers = #tpu.dot_dimension_numbers<[1], [1], [0], [0], [0, 0, 1, 0], [], []>} : vector<16x8xf32>, vector<16x8xf32>, vector<16x16xf32> -> vector<16x16xf32>
    %cst_97 = arith.constant 0.353553385 : f32
    %223 = vector.broadcast %cst_97 : f32 to vector<16x16xf32>
    %224 = arith.mulf %222, %223 : vector<16x16xf32>
    %225 = arith.addf %224, %23 : vector<16x16xf32>
    %cst_98 = arith.constant dense<0xFF800000> : vector<16xf32>
    %226 = vector.multi_reduction <maximumf>, %225, %cst_98 [1] : vector<16x16xf32> to vector<16xf32>
    %227 = vector.shape_cast %226 : vector<16xf32> to vector<16x1xf32>
    %228 = vector.broadcast %227 : vector<16x1xf32> to vector<16x16xf32>
    %229 = arith.subf %225, %228 : vector<16x16xf32>
    %230 = math.exp %229 : vector<16x16xf32>
    %cst_99 = arith.constant dense<0.000000e+00> : vector<16xf32>
    %231 = vector.multi_reduction <add>, %230, %cst_99 [1] : vector<16x16xf32> to vector<16xf32>
    %232 = vector.shape_cast %231 : vector<16xf32> to vector<16x1xf32>
    %233 = tpu.reciprocal %232 {approx = true} : vector<16x1xf32> -> vector<16x1xf32>
    %234 = vector.broadcast %233 : vector<16x1xf32> to vector<16x16xf32>
    %235 = arith.mulf %230, %234 : vector<16x16xf32>
    %cst_100 = arith.constant dense<0.000000e+00> : vector<16x8xf32>
    %236 = tpu.matmul %235, %221, %cst_100 {dimension_numbers = #tpu.dot_dimension_numbers<[1], [0], [0], [1], [0, 0, 1, 1], [], []>} : vector<16x16xf32>, vector<16x8xf32>, vector<16x8xf32> -> vector<16x8xf32>
    %237 = vector.extract_strided_slice %198 {offsets = [0, 16], sizes = [16, 8], strides = [1, 1]} : vector<16x32xf32> to vector<16x8xf32>
    %238 = vector.extract_strided_slice %199 {offsets = [0, 16], sizes = [16, 8], strides = [1, 1]} : vector<16x32xf32> to vector<16x8xf32>
    %239 = vector.extract_strided_slice %200 {offsets = [0, 16], sizes = [16, 8], strides = [1, 1]} : vector<16x32xf32> to vector<16x8xf32>
    %cst_101 = arith.constant dense<0.000000e+00> : vector<16x16xf32>
    %240 = tpu.matmul %237, %238, %cst_101 {dimension_numbers = #tpu.dot_dimension_numbers<[1], [1], [0], [0], [0, 0, 1, 0], [], []>} : vector<16x8xf32>, vector<16x8xf32>, vector<16x16xf32> -> vector<16x16xf32>
    %cst_102 = arith.constant 0.353553385 : f32
    %241 = vector.broadcast %cst_102 : f32 to vector<16x16xf32>
    %242 = arith.mulf %240, %241 : vector<16x16xf32>
    %243 = arith.addf %242, %23 : vector<16x16xf32>
    %cst_103 = arith.constant dense<0xFF800000> : vector<16xf32>
    %244 = vector.multi_reduction <maximumf>, %243, %cst_103 [1] : vector<16x16xf32> to vector<16xf32>
    %245 = vector.shape_cast %244 : vector<16xf32> to vector<16x1xf32>
    %246 = vector.broadcast %245 : vector<16x1xf32> to vector<16x16xf32>
    %247 = arith.subf %243, %246 : vector<16x16xf32>
    %248 = math.exp %247 : vector<16x16xf32>
    %cst_104 = arith.constant dense<0.000000e+00> : vector<16xf32>
    %249 = vector.multi_reduction <add>, %248, %cst_104 [1] : vector<16x16xf32> to vector<16xf32>
    %250 = vector.shape_cast %249 : vector<16xf32> to vector<16x1xf32>
    %251 = tpu.reciprocal %250 {approx = true} : vector<16x1xf32> -> vector<16x1xf32>
    %252 = vector.broadcast %251 : vector<16x1xf32> to vector<16x16xf32>
    %253 = arith.mulf %248, %252 : vector<16x16xf32>
    %cst_105 = arith.constant dense<0.000000e+00> : vector<16x8xf32>
    %254 = tpu.matmul %253, %239, %cst_105 {dimension_numbers = #tpu.dot_dimension_numbers<[1], [0], [0], [1], [0, 0, 1, 1], [], []>} : vector<16x16xf32>, vector<16x8xf32>, vector<16x8xf32> -> vector<16x8xf32>
    %255 = vector.extract_strided_slice %198 {offsets = [0, 24], sizes = [16, 8], strides = [1, 1]} : vector<16x32xf32> to vector<16x8xf32>
    %256 = vector.extract_strided_slice %199 {offsets = [0, 24], sizes = [16, 8], strides = [1, 1]} : vector<16x32xf32> to vector<16x8xf32>
    %257 = vector.extract_strided_slice %200 {offsets = [0, 24], sizes = [16, 8], strides = [1, 1]} : vector<16x32xf32> to vector<16x8xf32>
    %cst_106 = arith.constant dense<0.000000e+00> : vector<16x16xf32>
    %258 = tpu.matmul %255, %256, %cst_106 {dimension_numbers = #tpu.dot_dimension_numbers<[1], [1], [0], [0], [0, 0, 1, 0], [], []>} : vector<16x8xf32>, vector<16x8xf32>, vector<16x16xf32> -> vector<16x16xf32>
    %cst_107 = arith.constant 0.353553385 : f32
    %259 = vector.broadcast %cst_107 : f32 to vector<16x16xf32>
    %260 = arith.mulf %258, %259 : vector<16x16xf32>
    %261 = arith.addf %260, %23 : vector<16x16xf32>
    %cst_108 = arith.constant dense<0xFF800000> : vector<16xf32>
    %262 = vector.multi_reduction <maximumf>, %261, %cst_108 [1] : vector<16x16xf32> to vector<16xf32>
    %263 = vector.shape_cast %262 : vector<16xf32> to vector<16x1xf32>
    %264 = vector.broadcast %263 : vector<16x1xf32> to vector<16x16xf32>
    %265 = arith.subf %261, %264 : vector<16x16xf32>
    %266 = math.exp %265 : vector<16x16xf32>
    %cst_109 = arith.constant dense<0.000000e+00> : vector<16xf32>
    %267 = vector.multi_reduction <add>, %266, %cst_109 [1] : vector<16x16xf32> to vector<16xf32>
    %268 = vector.shape_cast %267 : vector<16xf32> to vector<16x1xf32>
    %269 = tpu.reciprocal %268 {approx = true} : vector<16x1xf32> -> vector<16x1xf32>
    %270 = vector.broadcast %269 : vector<16x1xf32> to vector<16x16xf32>
    %271 = arith.mulf %266, %270 : vector<16x16xf32>
    %cst_110 = arith.constant dense<0.000000e+00> : vector<16x8xf32>
    %272 = tpu.matmul %271, %257, %cst_110 {dimension_numbers = #tpu.dot_dimension_numbers<[1], [0], [0], [1], [0, 0, 1, 1], [], []>} : vector<16x16xf32>, vector<16x8xf32>, vector<16x8xf32> -> vector<16x8xf32>
    %273 = tpu.concatenate %218, %236, %254, %272 in 1 : vector<16x8xf32>, vector<16x8xf32>, vector<16x8xf32>, vector<16x8xf32> -> vector<16x32xf32>
    %c1_111 = arith.constant 1 : index
    %c0_112 = arith.constant 0 : index
    %c0_113 = arith.constant 0 : index
    %274 = vector.load %arg7[%c1_111, %c0_112, %c0_113] : memref<2x32x32xf32, #tpu.memory_space<vmem>>, vector<1x32x32xf32>
    %275 = vector.shape_cast %274 : vector<1x32x32xf32> to vector<32x32xf32>
    %cst_114 = arith.constant dense<0.000000e+00> : vector<16x32xf32>
    %276 = tpu.matmul %273, %275, %cst_114 {dimension_numbers = #tpu.dot_dimension_numbers<[1], [0], [0], [1], [0, 0, 1, 1], [], []>} : vector<16x32xf32>, vector<32x32xf32>, vector<16x32xf32> -> vector<16x32xf32>
    %c1_115 = arith.constant 1 : index
    %c0_116 = arith.constant 0 : index
    %c0_117 = arith.constant 0 : index
    %277 = vector.load %arg8[%c1_115, %c0_116, %c0_117] : memref<2x1x32xf32, #tpu.memory_space<vmem>>, vector<1x1x32xf32>
    %278 = vector.shape_cast %277 : vector<1x1x32xf32> to vector<1x32xf32>
    %279 = vector.broadcast %278 : vector<1x32xf32> to vector<16x32xf32>
    %280 = arith.addf %276, %279 : vector<16x32xf32>
    %281 = arith.addf %190, %280 : vector<16x32xf32>
    %c1_118 = arith.constant 1 : index
    %c0_119 = arith.constant 0 : index
    %c0_120 = arith.constant 0 : index
    %282 = vector.load %arg9[%c1_118, %c0_119, %c0_120] : memref<2x1x32xf32, #tpu.memory_space<vmem>>, vector<1x1x32xf32>
    %283 = vector.shape_cast %282 : vector<1x1x32xf32> to vector<1x32xf32>
    %c1_121 = arith.constant 1 : index
    %c0_122 = arith.constant 0 : index
    %c0_123 = arith.constant 0 : index
    %284 = vector.load %arg10[%c1_121, %c0_122, %c0_123] : memref<2x1x32xf32, #tpu.memory_space<vmem>>, vector<1x1x32xf32>
    %285 = vector.shape_cast %284 : vector<1x1x32xf32> to vector<1x32xf32>
    %cst_124 = arith.constant dense<0.000000e+00> : vector<16xf32>
    %286 = vector.multi_reduction <add>, %281, %cst_124 [1] : vector<16x32xf32> to vector<16xf32>
    %287 = vector.shape_cast %286 : vector<16xf32> to vector<16x1xf32>
    %cst_125 = arith.constant 3.200000e+01 : f32
    %288 = vector.broadcast %cst_125 : f32 to vector<16x1xf32>
    %289 = arith.divf %287, %288 : vector<16x1xf32>
    %290 = vector.broadcast %289 : vector<16x1xf32> to vector<16x32xf32>
    %291 = arith.subf %281, %290 : vector<16x32xf32>
    %292 = arith.mulf %291, %291 : vector<16x32xf32>
    %cst_126 = arith.constant dense<0.000000e+00> : vector<16xf32>
    %293 = vector.multi_reduction <add>, %292, %cst_126 [1] : vector<16x32xf32> to vector<16xf32>
    %294 = vector.shape_cast %293 : vector<16xf32> to vector<16x1xf32>
    %cst_127 = arith.constant 3.200000e+01 : f32
    %295 = vector.broadcast %cst_127 : f32 to vector<16x1xf32>
    %296 = arith.divf %294, %295 : vector<16x1xf32>
    %cst_128 = arith.constant 9.99999996E-13 : f32
    %297 = vector.broadcast %cst_128 : f32 to vector<16x1xf32>
    %298 = arith.addf %296, %297 : vector<16x1xf32>
    %299 = math.rsqrt %298 : vector<16x1xf32>
    %300 = vector.broadcast %299 : vector<16x1xf32> to vector<16x32xf32>
    %301 = arith.mulf %291, %300 : vector<16x32xf32>
    %302 = vector.broadcast %283 : vector<1x32xf32> to vector<16x32xf32>
    %303 = arith.mulf %301, %302 : vector<16x32xf32>
    %304 = vector.broadcast %285 : vector<1x32xf32> to vector<16x32xf32>
    %305 = arith.addf %303, %304 : vector<16x32xf32>
    %c1_129 = arith.constant 1 : index
    %c0_130 = arith.constant 0 : index
    %c0_131 = arith.constant 0 : index
    %306 = vector.load %arg11[%c1_129, %c0_130, %c0_131] : memref<2x32x64xf32, #tpu.memory_space<vmem>>, vector<1x32x64xf32>
    %307 = vector.shape_cast %306 : vector<1x32x64xf32> to vector<32x64xf32>
    %cst_132 = arith.constant dense<0.000000e+00> : vector<16x64xf32>
    %308 = tpu.matmul %305, %307, %cst_132 {dimension_numbers = #tpu.dot_dimension_numbers<[1], [0], [0], [1], [0, 0, 1, 1], [], []>} : vector<16x32xf32>, vector<32x64xf32>, vector<16x64xf32> -> vector<16x64xf32>
    %c1_133 = arith.constant 1 : index
    %c0_134 = arith.constant 0 : index
    %c0_135 = arith.constant 0 : index
    %309 = vector.load %arg12[%c1_133, %c0_134, %c0_135] : memref<2x1x64xf32, #tpu.memory_space<vmem>>, vector<1x1x64xf32>
    %310 = vector.shape_cast %309 : vector<1x1x64xf32> to vector<1x64xf32>
    %311 = vector.broadcast %310 : vector<1x64xf32> to vector<16x64xf32>
    %312 = arith.addf %308, %311 : vector<16x64xf32>
    %cst_136 = arith.constant 5.000000e-01 : f32
    %313 = vector.broadcast %cst_136 : f32 to vector<16x64xf32>
    %314 = arith.mulf %313, %312 : vector<16x64xf32>
    %cst_137 = arith.constant 4.471500e-02 : f32
    %315 = vector.broadcast %cst_137 : f32 to vector<16x64xf32>
    %316 = arith.mulf %315, %312 : vector<16x64xf32>
    %317 = arith.mulf %316, %312 : vector<16x64xf32>
    %318 = arith.mulf %317, %312 : vector<16x64xf32>
    %319 = arith.addf %312, %318 : vector<16x64xf32>
    %cst_138 = arith.constant 0.797884583 : f32
    %320 = vector.broadcast %cst_138 : f32 to vector<16x64xf32>
    %321 = arith.mulf %320, %319 : vector<16x64xf32>
    %322 = math.tanh %321 : vector<16x64xf32>
    %cst_139 = arith.constant 1.000000e+00 : f32
    %323 = vector.broadcast %cst_139 : f32 to vector<16x64xf32>
    %324 = arith.addf %323, %322 : vector<16x64xf32>
    %325 = arith.mulf %314, %324 : vector<16x64xf32>
    %c1_140 = arith.constant 1 : index
    %c0_141 = arith.constant 0 : index
    %c0_142 = arith.constant 0 : index
    %326 = vector.load %arg13[%c1_140, %c0_141, %c0_142] : memref<2x64x32xf32, #tpu.memory_space<vmem>>, vector<1x64x32xf32>
    %327 = vector.shape_cast %326 : vector<1x64x32xf32> to vector<64x32xf32>
    %cst_143 = arith.constant dense<0.000000e+00> : vector<16x32xf32>
    %328 = tpu.matmul %325, %327, %cst_143 {dimension_numbers = #tpu.dot_dimension_numbers<[1], [0], [0], [1], [0, 0, 1, 1], [], []>} : vector<16x64xf32>, vector<64x32xf32>, vector<16x32xf32> -> vector<16x32xf32>
    %c1_144 = arith.constant 1 : index
    %c0_145 = arith.constant 0 : index
    %c0_146 = arith.constant 0 : index
    %329 = vector.load %arg14[%c1_144, %c0_145, %c0_146] : memref<2x1x32xf32, #tpu.memory_space<vmem>>, vector<1x1x32xf32>
    %330 = vector.shape_cast %329 : vector<1x1x32xf32> to vector<1x32xf32>
    %331 = vector.broadcast %330 : vector<1x32xf32> to vector<16x32xf32>
    %332 = arith.addf %328, %331 : vector<16x32xf32>
    %333 = arith.addf %305, %332 : vector<16x32xf32>
    %c1_147 = arith.constant 1 : index
    %c0_148 = arith.constant 0 : index
    %c0_149 = arith.constant 0 : index
    %334 = vector.load %arg15[%c1_147, %c0_148, %c0_149] : memref<2x1x32xf32, #tpu.memory_space<vmem>>, vector<1x1x32xf32>
    %335 = vector.shape_cast %334 : vector<1x1x32xf32> to vector<1x32xf32>
    %c1_150 = arith.constant 1 : index
    %c0_151 = arith.constant 0 : index
    %c0_152 = arith.constant 0 : index
    %336 = vector.load %arg16[%c1_150, %c0_151, %c0_152] : memref<2x1x32xf32, #tpu.memory_space<vmem>>, vector<1x1x32xf32>
    %337 = vector.shape_cast %336 : vector<1x1x32xf32> to vector<1x32xf32>
    %cst_153 = arith.constant dense<0.000000e+00> : vector<16xf32>
    %338 = vector.multi_reduction <add>, %333, %cst_153 [1] : vector<16x32xf32> to vector<16xf32>
    %339 = vector.shape_cast %338 : vector<16xf32> to vector<16x1xf32>
    %cst_154 = arith.constant 3.200000e+01 : f32
    %340 = vector.broadcast %cst_154 : f32 to vector<16x1xf32>
    %341 = arith.divf %339, %340 : vector<16x1xf32>
    %342 = vector.broadcast %341 : vector<16x1xf32> to vector<16x32xf32>
    %343 = arith.subf %333, %342 : vector<16x32xf32>
    %344 = arith.mulf %343, %343 : vector<16x32xf32>
    %cst_155 = arith.constant dense<0.000000e+00> : vector<16xf32>
    %345 = vector.multi_reduction <add>, %344, %cst_155 [1] : vector<16x32xf32> to vector<16xf32>
    %346 = vector.shape_cast %345 : vector<16xf32> to vector<16x1xf32>
    %cst_156 = arith.constant 3.200000e+01 : f32
    %347 = vector.broadcast %cst_156 : f32 to vector<16x1xf32>
    %348 = arith.divf %346, %347 : vector<16x1xf32>
    %cst_157 = arith.constant 9.99999996E-13 : f32
    %349 = vector.broadcast %cst_157 : f32 to vector<16x1xf32>
    %350 = arith.addf %348, %349 : vector<16x1xf32>
    %351 = math.rsqrt %350 : vector<16x1xf32>
    %352 = vector.broadcast %351 : vector<16x1xf32> to vector<16x32xf32>
    %353 = arith.mulf %343, %352 : vector<16x32xf32>
    %354 = vector.broadcast %335 : vector<1x32xf32> to vector<16x32xf32>
    %355 = arith.mulf %353, %354 : vector<16x32xf32>
    %356 = vector.broadcast %337 : vector<1x32xf32> to vector<16x32xf32>
    %357 = arith.addf %355, %356 : vector<16x32xf32>
    %c0_158 = arith.constant 0 : index
    %c0_159 = arith.constant 0 : index
    %358 = vector.load %arg17[%c0_158, %c0_159] : memref<16x32xf32, #tpu.memory_space<vmem>>, vector<16x32xf32>
    tpu.vector_store %arg17[%c0_158, %c0_159], %357 {strides = array<i32>} : memref<16x32xf32, #tpu.memory_space<vmem>>, vector<16x32xf32>,
    %c0_160 = arith.constant 0 : index
    %c0_161 = arith.constant 0 : index
    %359 = vector.load %arg2[%c0_160, %c0_161] : memref<2x16xf32, #tpu.memory_space<vmem>>, vector<2x16xf32>
    %cst_162 = arith.constant dense<0.000000e+00> : vector<2x32xf32>
    %360 = tpu.matmul %359, %357, %cst_162 {dimension_numbers = #tpu.dot_dimension_numbers<[1], [0], [0], [1], [0, 0, 1, 1], [], []>} : vector<2x16xf32>, vector<16x32xf32>, vector<2x32xf32> -> vector<2x32xf32>
    %c0_163 = arith.constant 0 : index
    %c0_164 = arith.constant 0 : index
    %361 = vector.load %arg18[%c0_163, %c0_164] : memref<2x32xf32, #tpu.memory_space<vmem>>, vector<2x32xf32>
    tpu.vector_store %arg18[%c0_163, %c0_164], %360 {strides = array<i32>} : memref<2x32xf32, #tpu.memory_space<vmem>>, vector<2x32xf32>,
    return
  }
}

</mosaic_0001>

<bundles_post_ra>
// kernel: bert_forward_core.1
= control target key start
LH: loop header
LB: loop body
LE: loop exit
PB: predicated region body
PF: predicated region fallthrough
CT: control target
= control target key end

     0   :  { %s2546_s0 = inlined_call_operand.vmem [shape: f32[16,32], index: 0, kind: input, shape index: {}]   ;;  %s2547_s1 = inlined_call_operand.vmem [shape: f32[16,16], index: 1, kind: input, shape index: {}]   ;;  %s2548_s2 = inlined_call_operand.vmem [shape: f32[2,16], index: 2, kind: input, shape index: {}]   ;;  %s2549_s3 = inlined_call_operand.vmem [shape: f32[1,32], index: 3, kind: input, shape index: {}]   ;;  %s2550_s4 = inlined_call_operand.vmem [shape: f32[1,32], index: 4, kind: input, shape index: {}]   ;;  %s2551_s5 = inlined_call_operand.vmem [shape: f32[2,32,96], index: 5, kind: input, shape index: {}]   ;;  %s2552_s6 = inlined_call_operand.vmem [shape: f32[2,1,96], index: 6, kind: input, shape index: {}]   ;;  %s2553_s7 = inlined_call_operand.vmem [shape: f32[2,32,32], index: 7, kind: input, shape index: {}]   ;;  %s2554_s8 = inlined_call_operand.vmem [shape: f32[2,1,32], index: 8, kind: input, shape index: {}]   ;;  %s2555_s9 = inlined_call_operand.vmem [shape: f32[2,1,32], index: 9, kind: input, shape index: {}]   ;;  %s2556_s10 = inlined_call_operand.vmem [shape: f32[2,1,32], index: 10, kind: input, shape index: {}]   ;;  %s2557_s11 = inlined_call_operand.vmem [shape: f32[2,32,64], index: 11, kind: input, shape index: {}]   ;;  %s2558_s12 = inlined_call_operand.vmem [shape: f32[2,1,64], index: 12, kind: input, shape index: {}]   ;;  %s2559_s13 = inlined_call_operand.vmem [shape: f32[2,64,32], index: 13, kind: input, shape index: {}]   ;;  %s2560_s14 = inlined_call_operand.vmem [shape: f32[2,1,32], index: 14, kind: input, shape index: {}]   ;;  %s2561_s15 = inlined_call_operand.vmem [shape: f32[2,1,32], index: 15, kind: input, shape index: {}]   ;;  %s2562_s16 = inlined_call_operand.vmem [shape: f32[2,1,32], index: 16, kind: input, shape index: {}]   ;;  %s2563_s17 = inlined_call_operand.vmem [shape: f32[16,32], index: 17, kind: output, shape index: {0}]   ;;  %s2564_s18 = inlined_call_operand.hbm [shape: f32[2,32], index: 18, kind: output, shape index: {1}]  }
   0x1   :  { %2577 = sst [smem:[#allocation5_spill]] %s2546_s0 }
   0x2   :  { %2578 = sst [smem:[#allocation6_spill]] %s2547_s1 }
   0x3   :  { %2579 = sst [smem:[#allocation7_spill]] %s2548_s2 }
   0x4   :  { %s2580_s29 = sld [smem:[#allocation5_spill]]  ;;  %vm63_vm0 = vcmask 261120  }
   0xa   :  { %v59_v0 = vld [vmem:[%s2580_s29] sm:$0xff]  ;;  %v60_v2 = vld [vmem:[%s2580_s29 + $0x8] sm:$0xff] }
   0xb   :  { %v64_v1 = vsel %vm63_vm0, %v59_v0, 0.0  ;;  %v67_v3 = vsel %vm63_vm0, %v60_v2, 0.0 }
   0xc   :  { %65 = vadd.xlane.f32.xlu0 %v64_v1 }
   0xd   :  { %24 = vsyncpa [#allocation3], 0  ;;  %v1906_v4 = vmov 32.0   ;;  %v130_v21 = vld [vmem:[%s2551_s5 + $0x18] sm:$0xff]  ;;  %v129_v22 = vld [vmem:[%s2551_s5 + $0x10] sm:$0xff]  ;;  %s1907_s29 = smov 88  }
   0xe   :  { %1786 = vrcp.f32 %v1906_v4  ;;  %153 = vmatpush.msra.mxu0 %v130_v21  ;;  %v128_v23 = vld [vmem:[%s2551_s5 + $0x8] sm:$0xff]  ;;  %v127_v24 = vld [vmem:[%s2551_s5] sm:$0xff]  ;;  %s1908_s30 = smov 80   ;;  %s1909_s0 = smov 96   ;;  %vm170_vm8 = vcmask 64512   ;;  %vm206_vm9 = vcmask 130048  }
   0xf   :  { %v1768_v39 = vld [vmem:[%s2549_s3] ss:$0 sm:$0xff]  ;;  %s1910_s19 = smov 112   ;;  %s1911_s1 = smov 72   ;;  %vm592_vm10 = vcmask 195584  }
  0x10   :  { %154 = vmatpush.msra.mxu0 %v129_v22  ;;  %v1769_v43 = vld [vmem:[%s2550_s4] ss:$0 sm:$0xff]  ;;  %s1912_s20 = smov 120   ;;  %s1913_s21 = smov 104  }
  0x11   :  { %v1770_v53 = vld [vmem:[%s2552_s6] ss:$0 sm:$0xff]  ;;  %s2581_s23 = sld [smem:[#allocation6_spill]]  ;;  %s2571_s26 = smov 64  }
  0x12   :  { %155 = vmatpush.msra.mxu0 %v128_v23  ;;  %s2576_s27 = smov 56   ;;  %s2568_s28 = smov 40  }
  0x13   :  { %s2567_s3 = smov 48   ;;  %s2569_s4 = smov 8  }
  0x14   :  { %68 = vadd.xlane.f32.xlu0 %v67_v3  ;;  %v1787_v5 = vpop.eup %1786  ;;  %156 = vmatpush.msra.mxu0 %v127_v24  ;;  %s2572_s22 = smov 24   ;;  %s2574_s2 = smov 16  }
  0x15   :  { %v71_v6 = vmul.f32 32.0, %v1787_v5  ;;  %vm75_vm1 = vweird.f32 %v1787_v5 }
  0x17   :  { %v72_v7 = vsub.f32 1.0, %v71_v6 }
  0x19   :  { %v73_v8 = vmul.f32 %v1787_v5, %v72_v7 }
  0x1b   :  { %v74_v9 = vadd.f32 %v1787_v5, %v73_v8 }
  0x1d   :  { %v2025_v10 = vsel %vm75_vm1, %v1787_v5, %v74_v9  ;;  %v2115_v9 = vld [vmem:[%s2581_s23] sm:$0xff] }
  0x7f   :  { %v66_v11 = vpop.xlane.xlu0 %65 }
  0x80   :  { %v77_v12 = vmul.f32 %v2025_v10, %v66_v11 }
  0x82   :  { %v79_v13 = vsub.f32 %v59_v0, %v77_v12 }
  0x84   :  { %v81_v14 = vmul.f32 %v79_v13, %v79_v13 }
  0x86   :  { %v83_v15 = vsel %vm63_vm0, %v81_v14, 0.0 }
  0x87   :  { %84 = vadd.xlane.f32.xlu1 %v83_v15  ;;  %v69_v16 = vpop.xlane.xlu0 %68  ;;  %v2122_v15 = vld [vmem:[%s2581_s23 + $0x8] sm:$0xff] }
  0x88   :  { %v78_v17 = vmul.f32 %v2025_v10, %v69_v16 }
  0x8a   :  { %v80_v18 = vsub.f32 %v60_v2, %v78_v17 }
  0x8c   :  { %v82_v19 = vmul.f32 %v80_v18, %v80_v18 }
  0x8e   :  { %v86_v20 = vsel %vm63_vm0, %v82_v19, 0.0 }
  0x8f   :  { %87 = vadd.xlane.f32.xlu1 %v86_v20 }
  0xfa   :  { %v85_v25 = vpop.xlane.xlu1 %84 }
  0xfb   :  { %v89_v26 = vmul.f32 %v85_v25, %v2025_v10 }
  0xfd   :  { %v91_v27 = vadd.f32 1e-12, %v89_v26 }
  0xff   :  { %1788 = vrsqrt.f32 %v91_v27  ;;  %vm99_vm3 = vweird.f32 %v91_v27 }
 0x102   :  { %v88_v28 = vpop.xlane.xlu1 %87 }
 0x103   :  { %v90_v29 = vmul.f32 %v88_v28, %v2025_v10 }
 0x105   :  { %v1789_v30 = vpop.eup %1788  ;;  %v92_v31 = vadd.f32 1e-12, %v90_v29 }
 0x106   :  { %v94_v32 = vmul.f32 %v1789_v30, %v91_v27  ;;  %vm100_vm2 = vweird.f32 %v1789_v30 }
 0x107   :  { %1790 = vrsqrt.f32 %v92_v31  ;;  %vm101_vm4 = vmor %vm99_vm3, %vm100_vm2  ;;  %vm109_vm6 = vweird.f32 %v92_v31  ;;  %vm757_vm2 = vcmask 523264  }
 0x108   :  { %v95_v33 = vmul.f32 %v1789_v30, %v94_v32 }
 0x10a   :  { %v96_v34 = vmul.f32 0.5, %v95_v33 }
 0x10c   :  { %v97_v35 = vsub.f32 1.5, %v96_v34 }
 0x10d   :  { %v1791_v36 = vpop.eup %1790 }
 0x10e   :  { %v98_v37 = vmul.f32 %v1789_v30, %v97_v35  ;;  %v104_v38 = vmul.f32 %v1791_v36, %v92_v31  ;;  %vm110_vm5 = vweird.f32 %v1791_v36 }
 0x10f   :  { %vm111_vm7 = vmor %vm109_vm6, %vm110_vm5 }
 0x110   :  { %v102_v40 = vsel %vm101_vm4, %v1789_v30, %v98_v37  ;;  %v105_v41 = vmul.f32 %v1791_v36, %v104_v38 }
 0x111   :  { %v113_v42 = vmul.f32 %v102_v40, %v79_v13 }
 0x112   :  { %v106_v44 = vmul.f32 0.5, %v105_v41 }
 0x113   :  { %v118_v45 = vmul.f32 %v1768_v39, %v113_v42 }
 0x114   :  { %v107_v46 = vsub.f32 1.5, %v106_v44 }
 0x115   :  { %v2051_v47 = vadd.f32 %v1769_v43, %v118_v45 }
 0x116   :  { %v108_v48 = vmul.f32 %v1791_v36, %v107_v46 }
 0x117   :  { %1619 = vmatmul.msk.f32.vlgmr.msra.gmra.mxu0 %vm63_vm0, %v2051_v47 }
 0x118   :  { %v112_v49 = vsel %vm111_vm7, %v1791_v36, %v108_v48 }
 0x119   :  { %v114_v50 = vmul.f32 %v112_v49, %v80_v18 }
 0x11b   :  { %v119_v51 = vmul.f32 %v1768_v39, %v114_v50 }
 0x11d   :  { %v2055_v52 = vadd.f32 %v1769_v43, %v119_v51 }
 0x11f   :  { %1620 = vmatmul.msk.f32.gmra.mxu0 %vm63_vm0, %v2055_v52 }
 0x194   :  { %v158_v54 = vpop.f32.mrf.mxu0 }
 0x195   :  { %v2062_v55 = vadd.f32 %v1770_v53, %v158_v54 }
 0x197   :  { %268 = vrot.lane.b32.xlu1 %v2062_v55, %s1907_s29 }
 0x19c   :  { %v161_v56 = vpop.f32.mrf.mxu0 }
 0x19d   :  { %v2066_v57 = vadd.f32 %v1770_v53, %v161_v56 }
 0x19f   :  { %370 = vrot.lane.b32.xlu1 %v2066_v57, %s1908_s30  ;;  %270 = vrot.lane.b32.xlu0 %v2066_v57, %s1907_s29  ;;  %v2146_v43 = vpack.i.bf16 %v2062_v55, %v2066_v57 }
 0x1a0   :  { %168 = vrot.lane.b32.xlu2 %v2066_v57, %s1909_s0 }
 0x1a7   :  { %364 = vrot.lane.b32.xlu1 %v2062_v55, %s1910_s19  ;;  %468 = vrot.lane.b32.xlu0 %v2062_v55, %s1911_s1 }
 0x1a8   :  { %166 = vrot.lane.b32.xlu2 %v2062_v55, %s1909_s0 }
 0x1af   :  { %368 = vrot.lane.b32.xlu0 %v2062_v55, %s1908_s30 }
 0x1b0   :  { %264 = vrot.lane.b32.xlu2 %v2062_v55, %s1912_s20 }
 0x1b7   :  { %366 = vrot.lane.b32.xlu0 %v2066_v57, %s1910_s19 }
 0x1b8   :  { %266 = vrot.lane.b32.xlu2 %v2066_v57, %s1912_s20 }
 0x1c0   :  { %470 = vrot.lane.b32.xlu2 %v2066_v57, %s1911_s1 }
 0x1c8   :  { %464 = vrot.lane.b32.xlu2 %v2062_v55, %s1913_s21 }
 0x1d0   :  { %466 = vrot.lane.b32.xlu2 %v2066_v57, %s1913_s21 }
 0x1fa   :  { %v169_v58 = vpop.permute.xlu2 %168 }
 0x1fb   :  { %1621 = vmatpush.xpose.msk.msra.mxu1 %vm170_vm8, %v169_v58 }
 0x202   :  { %v167_v59 = vpop.permute.xlu2 %166 }
 0x203   :  { %1622 = vmatpush.xpose.msk.msra.mxu1 %vm170_vm8, %v167_v59 }
 0x206   :  { %1623 = vmatmul.msk.f32.vlgmr.msra.gmra.mxu1 %vm170_vm8, %v2062_v55 }
 0x209   :  { %v269_v60 = vpop.permute.xlu1 %268 }
 0x20a   :  { %v265_v61 = vpop.permute.xlu2 %264 }
 0x20e   :  { %1624 = vmatmul.msk.f32.gmra.mxu1 %vm170_vm8, %v2066_v57 }
 0x211   :  { %v271_v62 = vpop.permute.xlu0 %270  ;;  %v371_v63 = vpop.permute.xlu1 %370 }
 0x212   :  { %v267_v0 = vpop.permute.xlu2 %266  ;;  %1627 = vmatpush.xpose.msk.msra.mxu3 %vm170_vm8, %v271_v62  ;;  %1633 = vmatpush.xpose.msk.msrb.mxu0 %vm170_vm8, %v371_v63 }
 0x216   :  { %1628 = vmatpush.xpose.msk.msra.mxu3 %vm170_vm8, %v269_v60 }
 0x219   :  { %v469_v1 = vpop.permute.xlu0 %468  ;;  %1629 = vmatmul.msk.f32.vlgmr.msra.gmra.mxu3 %vm170_vm8, %v265_v61  ;;  %v365_v4 = vpop.permute.xlu1 %364 }
 0x21a   :  { %v471_v2 = vpop.permute.xlu2 %470 }
 0x21b   :  { %1639 = vmatpush.xpose.msk.msrb.mxu3 %vm170_vm8, %v471_v2 }
 0x21f   :  { %1640 = vmatpush.xpose.msk.msrb.mxu3 %vm170_vm8, %v469_v1 }
 0x221   :  { %v369_v3 = vpop.permute.xlu0 %368  ;;  %1630 = vmatmul.msk.f32.gmra.mxu3 %vm170_vm8, %v267_v0 }
 0x222   :  { %1634 = vmatpush.xpose.msk.msrb.mxu0 %vm170_vm8, %v369_v3  ;;  %v465_v5 = vpop.permute.xlu2 %464 }
 0x225   :  { %1635 = vmatmul.msk.f32.vlgmr.msrb.gmra.mxu0 %vm170_vm8, %v365_v4 }
 0x229   :  { %1641 = vmatmul.msk.f32.vlgmr.msrb.gmra.mxu3 %vm170_vm8, %v465_v5  ;;  %v367_v6 = vpop.permute.xlu0 %366 }
 0x22a   :  { %v467_v7 = vpop.permute.xlu2 %466 }
 0x22d   :  { %1636 = vmatmul.msk.f32.gmra.mxu0 %vm170_vm8, %v367_v6 }
 0x231   :  { %1642 = vmatmul.msk.f32.gmra.mxu3 %vm170_vm8, %v467_v7 }
 0x283   :  { %v196_v8 = vpop.f32.mrf.mxu1 }
 0x284   :  { %v202_v11 = vmul.f32 0.35355338, %v196_v8 }
 0x286   :  { %v204_v12 = vadd.f32 %v202_v11, %v2115_v9 }
 0x288   :  { %v207_v13 = vsel %vm206_vm9, %v204_v12, -inf }
 0x289   :  { %208 = vmax.xlane.f32.xlu2 %v207_v13 }
 0x28b   :  { %v199_v14 = vpop.f32.mrf.mxu1 }
 0x28c   :  { %v203_v16 = vmul.f32 0.35355338, %v199_v14 }
 0x28e   :  { %v205_v17 = vadd.f32 %v203_v16, %v2122_v15 }
 0x290   :  { %v210_v18 = vsel %vm206_vm9, %v205_v17, -inf }
 0x291   :  { %211 = vmax.xlane.f32.xlu1 %v210_v18 }
 0x29c   :  { %v297_v19 = vpop.f32.mrf.mxu3 }
 0x29d   :  { %v303_v25 = vmul.f32 0.35355338, %v297_v19 }
 0x29f   :  { %v305_v31 = vadd.f32 %v303_v25, %v2115_v9 }
 0x2a1   :  { %v307_v35 = vsel %vm206_vm9, %v305_v31, -inf }
 0x2a2   :  { %v397_v20 = vpop.f32.mrf.mxu0 }
 0x2a3   :  { %v403_v21 = vmul.f32 0.35355338, %v397_v20 }
 0x2a4   :  { %v300_v22 = vpop.f32.mrf.mxu3 }
 0x2a5   :  { %v304_v23 = vmul.f32 0.35355338, %v300_v22  ;;  %v405_v24 = vadd.f32 %v403_v21, %v2115_v9 }
 0x2a7   :  { %v407_v26 = vsel %vm206_vm9, %v405_v24, -inf  ;;  %v2129_v27 = vadd.f32 %v304_v23, %v2122_v15 }
 0x2a8   :  { %408 = vmax.xlane.f32.xlu0 %v407_v26 }
 0x2a9   :  { %v310_v28 = vsel %vm206_vm9, %v2129_v27, -inf }
 0x2aa   :  { %311 = vmax.xlane.f32.xlu2 %v310_v28  ;;  %v400_v29 = vpop.f32.mrf.mxu0 }
 0x2ab   :  { %v404_v30 = vmul.f32 0.35355338, %v400_v29 }
 0x2ac   :  { %v497_v32 = vpop.f32.mrf.mxu3 }
 0x2ad   :  { %v2135_v33 = vadd.f32 %v404_v30, %v2122_v15  ;;  %v503_v34 = vmul.f32 0.35355338, %v497_v32 }
 0x2af   :  { %v410_v36 = vsel %vm206_vm9, %v2135_v33, -inf  ;;  %v505_v37 = vadd.f32 %v503_v34, %v2115_v9 }
 0x2b0   :  { %308 = vmax.xlane.f32.xlu0 %v307_v35  ;;  %411 = vmax.xlane.f32.xlu1 %v410_v36 }
 0x2b1   :  { %v507_v40 = vsel %vm206_vm9, %v505_v37, -inf }
 0x2b4   :  { %v500_v38 = vpop.f32.mrf.mxu3 }
 0x2b5   :  { %v504_v39 = vmul.f32 0.35355338, %v500_v38 }
 0x2b7   :  { %v506_v41 = vadd.f32 %v504_v39, %v2122_v15 }
 0x2b8   :  { %508 = vmax.xlane.f32.xlu1 %v507_v40 }
 0x2b9   :  { %v510_v42 = vsel %vm206_vm9, %v506_v41, -inf }
 0x2ba   :  { %511 = vmax.xlane.f32.xlu2 %v510_v42 }
 0x2d2   :  { %1729 = vrot.lane.b32.xlu2 %v2146_v43, %s2571_s26 }
 0x2fc   :  { %v209_v44 = vpop.xlane.xlu2 %208 }
 0x2fd   :  { %v213_v45 = vsub.f32 %v204_v12, %v209_v44 }
 0x2ff   :  { %v215_v46 = vmul.f32 1.442695, %v213_v45 }
 0x301   :  { %1792 = vpow2.f32 %v215_v46 }
 0x304   :  { %v212_v48 = vpop.xlane.xlu1 %211 }
 0x305   :  { %v214_v49 = vsub.f32 %v205_v17, %v212_v48 }
 0x307   :  { %v1793_v50 = vpop.eup %1792  ;;  %v217_v51 = vmul.f32 1.442695, %v214_v49 }
 0x308   :  { %v219_v53 = vsel %vm206_vm9, %v1793_v50, 0.0 }
 0x309   :  { %1794 = vpow2.f32 %v217_v51  ;;  %220 = vadd.xlane.f32.xlu0 %v219_v53 }
 0x30f   :  { %v1795_v54 = vpop.eup %1794 }
 0x310   :  { %v222_v55 = vsel %vm206_vm9, %v1795_v54, 0.0 }
 0x311   :  { %223 = vadd.xlane.f32.xlu1 %v222_v55 }
 0x31b   :  { %v409_v56 = vpop.xlane.xlu0 %408 }
 0x31c   :  { %v413_v57 = vsub.f32 %v405_v24, %v409_v56 }
 0x31d   :  { %v312_v61 = vpop.xlane.xlu2 %311 }
 0x31e   :  { %v415_v58 = vmul.f32 1.442695, %v413_v57  ;;  %v314_v14 = vsub.f32 %v2129_v27, %v312_v61 }
 0x320   :  { %1796 = vpow2.f32 %v415_v58  ;;  %v317_v16 = vmul.f32 1.442695, %v314_v14 }
 0x323   :  { %v309_v59 = vpop.xlane.xlu0 %308  ;;  %v412_v13 = vpop.xlane.xlu1 %411 }
 0x324   :  { %v313_v60 = vsub.f32 %v305_v31, %v309_v59  ;;  %v414_v34 = vsub.f32 %v2135_v33, %v412_v13 }
 0x326   :  { %v2152_v62 = vpop.eup %1796  ;;  %v315_v63 = vmul.f32 1.442695, %v313_v60  ;;  %v417_v36 = vmul.f32 1.442695, %v414_v34 }
 0x327   :  { %v419_v0 = vsel %vm206_vm9, %v2152_v62, 0.0 }
 0x328   :  { %1798 = vpow2.f32 %v315_v63  ;;  %420 = vadd.xlane.f32.xlu2 %v419_v0 }
 0x32a   :  { %1734 = vrot.lane.b32.xlu1 %v2146_v43, %s2576_s27 }
 0x32b   :  { %v509_v17 = vpop.xlane.xlu1 %508 }
 0x32c   :  { %v513_v18 = vsub.f32 %v505_v37, %v509_v17 }
 0x32d   :  { %v512_v1 = vpop.xlane.xlu2 %511 }
 0x32e   :  { %v1799_v2 = vpop.eup %1798  ;;  %v514_v7 = vsub.f32 %v506_v41, %v512_v1  ;;  %v515_v19 = vmul.f32 1.442695, %v513_v18 }
 0x32f   :  { %v319_v3 = vsel %vm206_vm9, %v1799_v2, 0.0 }
 0x330   :  { %320 = vadd.xlane.f32.xlu0 %v319_v3  ;;  %v517_v8 = vmul.f32 1.442695, %v514_v7  ;;  %v598_v7 = vld [vmem:[%s2553_s7 + $0x18] sm:$0xff] }
 0x331   :  { %621 = vmatpush.msra.mxu0 %v598_v7 }
 0x332   :  { %1800 = vpow2.f32 %v517_v8  ;;  %v597_v8 = vld [vmem:[%s2553_s7 + $0x10] sm:$0xff] }
 0x333   :  { %1802 = vpow2.f32 %v317_v16  ;;  %622 = vmatpush.msra.mxu0 %v597_v8 }
 0x334   :  { %1804 = vpow2.f32 %v515_v19 }
 0x335   :  { %v1730_v4 = vpop.permute.xlu2 %1729 }
 0x336   :  { %v1731_v5 = vunpack.i.l.bf16 %v1730_v4  ;;  %v1732_v6 = vunpack.i.h.bf16 %v1730_v4 }
 0x338   :  { %255 = vmatpush.msra.mxu2 %v1731_v5  ;;  %v2161_v11 = vpop.eup %1800 }
 0x339   :  { %v522_v12 = vsel %vm206_vm9, %v2161_v11, 0.0  ;;  %v1803_v20 = vpop.eup %1802 }
 0x33a   :  { %256 = vmatpush.msra.mxu2 %v1732_v6  ;;  %v322_v21 = vsel %vm206_vm9, %v1803_v20, 0.0  ;;  %v1805_v22 = vpop.eup %1804 }
 0x33b   :  { %v519_v23 = vsel %vm206_vm9, %v1805_v22, 0.0 }
 0x344   :  { %1739 = vrot.lane.b32.xlu0 %v2146_v43, %s2568_s28 }
 0x354   :  { %523 = vadd.xlane.f32.xlu1 %v522_v12  ;;  %v595_v12 = vld [vmem:[%s2553_s7] sm:$0xff] }
 0x36e   :  { %323 = vadd.xlane.f32.xlu0 %v322_v21 }
 0x376   :  { %520 = vadd.xlane.f32.xlu0 %v519_v23 }
 0x37c   :  { %v221_v24 = vpop.xlane.xlu0 %220 }
 0x37d   :  { %1806 = vrcp.f32 %v221_v24 }
 0x383   :  { %v1807_v25 = vpop.eup %1806 }
 0x384   :  { %v224_v26 = vpop.xlane.xlu1 %223  ;;  %v227_v28 = vmul.f32 %v1807_v25, %v1793_v50 }
 0x385   :  { %1808 = vrcp.f32 %v224_v26  ;;  %v1771_v26 = vld [vmem:[%s2554_s8] ss:$0 sm:$0xff] }
 0x386   :  { %1625 = vmatmul.msk.f32.vlgmr.msra.gmra.mxu2 %vm206_vm9, %v227_v28 }
 0x38a   :  { %1744 = vrot.lane.b32.xlu0 %v2146_v43, %s2567_s3 }
 0x38b   :  { %v1809_v27 = vpop.eup %1808 }
 0x38c   :  { %v228_v29 = vmul.f32 %v1809_v27, %v1795_v54 }
 0x38e   :  { %1626 = vmatmul.msk.f32.gmra.mxu2 %vm206_vm9, %v228_v29 }
 0x39b   :  { %v421_v51 = vpop.xlane.xlu2 %420 }
 0x39c   :  { %v1735_v30 = vpop.permute.xlu1 %1734 }
 0x39d   :  { %v1736_v31 = vunpack.i.l.bf16 %v1735_v30  ;;  %v1737_v32 = vunpack.i.h.bf16 %v1735_v30 }
 0x39f   :  { %355 = vmatpush.msrb.mxu2 %v1736_v31 }
 0x3a1   :  { %356 = vmatpush.msrb.mxu2 %v1737_v32 }
 0x3a3   :  { %v321_v35 = vpop.xlane.xlu0 %320 }
 0x3a4   :  { %1810 = vrcp.f32 %v321_v35 }
 0x3a5   :  { %1812 = vpow2.f32 %v417_v36 }
 0x3aa   :  { %v1811_v37 = vpop.eup %1810 }
 0x3ab   :  { %v327_v38 = vmul.f32 %v1811_v37, %v1799_v2  ;;  %v1813_v39 = vpop.eup %1812 }
 0x3ac   :  { %v422_v40 = vsel %vm206_vm9, %v1813_v39, 0.0 }
 0x3ad   :  { %1631 = vmatmul.msk.f32.vlgmr.msrb.gmra.mxu2 %vm206_vm9, %v327_v38 }
 0x3b4   :  { %423 = vadd.xlane.f32.xlu0 %v422_v40 }
 0x3b6   :  { %v1740_v41 = vpop.permute.xlu0 %1739 }
 0x3b7   :  { %v1741_v42 = vunpack.i.l.bf16 %v1740_v41  ;;  %v1742_v43 = vunpack.i.h.bf16 %v1740_v41 }
 0x3b9   :  { %555 = vmatpush.msra.mxu2 %v1741_v42 }
 0x3bb   :  { %556 = vmatpush.msra.mxu2 %v1742_v43 }
 0x3c7   :  { %v524_v48 = vpop.xlane.xlu1 %523 }
 0x3e1   :  { %v324_v44 = vpop.xlane.xlu0 %323 }
 0x3e2   :  { %1814 = vrcp.f32 %v324_v44 }
 0x3e8   :  { %v1815_v33 = vpop.eup %1814 }
 0x3e9   :  { %v521_v45 = vpop.xlane.xlu0 %520  ;;  %v328_v46 = vmul.f32 %v1815_v33, %v1803_v20  ;;  %v692_v33 = vld [vmem:[%s2557_s11 + $0x10] sm:$0xff] }
 0x3ea   :  { %1816 = vrcp.f32 %v521_v45  ;;  %v691_v45 = vld [vmem:[%s2557_s11 + $0x8] sm:$0xff] }
 0x3eb   :  { %1632 = vmatmul.msk.f32.gmra.mxu2 %vm206_vm9, %v328_v46  ;;  %1818 = vrcp.f32 %v524_v48  ;;  %v690_v46 = vld [vmem:[%s2557_s11] sm:$0xff] }
 0x3ec   :  { %1820 = vrcp.f32 %v421_v51 }
 0x3f0   :  { %v1817_v49 = vpop.eup %1816 }
 0x3f1   :  { %v527_v50 = vmul.f32 %v1817_v49, %v1805_v22  ;;  %v1819_v53 = vpop.eup %1818 }
 0x3f2   :  { %v528_v54 = vmul.f32 %v1819_v53, %v2161_v11  ;;  %v1821_v56 = vpop.eup %1820  ;;  %v596_v11 = vld [vmem:[%s2553_s7 + $0x8] sm:$0xff] }
 0x3f3   :  { %1643 = vmatmul.msk.f32.vlgmr.msra.gmra.mxu2 %vm206_vm9, %v527_v50  ;;  %v427_v59 = vmul.f32 %v1821_v56, %v2152_v62  ;;  %623 = vmatpush.msra.mxu0 %v596_v11 }
 0x3f5   :  { %624 = vmatpush.msra.mxu0 %v595_v12 }
 0x3fb   :  { %1644 = vmatmul.msk.f32.gmra.mxu2 %vm206_vm9, %v528_v54 }
 0x3fc   :  { %v1745_v55 = vpop.permute.xlu0 %1744 }
 0x3fd   :  { %v1746_v57 = vunpack.i.l.bf16 %v1745_v55  ;;  %v1747_v58 = vunpack.i.h.bf16 %v1745_v55 }
 0x3ff   :  { %455 = vmatpush.msrb.mxu1 %v1746_v57 }
 0x401   :  { %456 = vmatpush.msrb.mxu1 %v1747_v58  ;;  %v1772_v58 = vld [vmem:[%s2555_s9] ss:$0 sm:$0xff] }
 0x402   :  { %1637 = vmatmul.msk.f32.vlgmr.msrb.gmra.mxu1 %vm206_vm9, %v427_v59 }
 0x409   :  { %v258_v60 = vpop.f32.mrf.mxu2 }
 0x411   :  { %v261_v63 = vpop.f32.mrf.mxu2 }
 0x427   :  { %v424_v61 = vpop.xlane.xlu0 %423 }
 0x428   :  { %1822 = vrcp.f32 %v424_v61  ;;  %v1773_v61 = vld [vmem:[%s2556_s10] ss:$0 sm:$0xff] }
 0x42e   :  { %v1823_v0 = vpop.eup %1822 }
 0x42f   :  { %v428_v1 = vmul.f32 %v1823_v0, %v1813_v39 }
 0x430   :  { %v358_v2 = vpop.f32.mrf.mxu2 }
 0x431   :  { %1638 = vmatmul.msk.f32.gmra.mxu1 %vm206_vm9, %v428_v1  ;;  %566 = vrot.lane.b32.xlu2 %v358_v2, %s2569_s4 }
 0x46e   :  { %v361_v3 = vpop.f32.mrf.mxu2 }
 0x476   :  { %v558_v4 = vpop.f32.mrf.mxu2 }
 0x477   :  { %582 = vrot.lane.b32.xlu2 %v558_v4, %s2572_s22 }
 0x47e   :  { %v561_v5 = vpop.f32.mrf.mxu2 }
 0x47f   :  { %v458_v62 = vpop.f32.mrf.mxu1  ;;  %568 = vrot.lane.b32.xlu2 %v361_v3, %s2569_s4 }
 0x480   :  { %574 = vrot.lane.b32.xlu1 %v458_v62, %s2574_s2 }
 0x488   :  { %584 = vrot.lane.b32.xlu1 %v561_v5, %s2572_s22  ;;  %s1608_s22 = sshll.u32 %s2564_s18, 4  ;;  %s1609_s22 = int_to_ptr.hbm [resolvable:$true] %s1608_s22 }
 0x48b   :  { %v567_v13 = vpop.permute.xlu2 %566 }
 0x48c   :  { %v588_v14 = vsel %vm170_vm8, %v258_v60, %v567_v13 }
 0x4ae   :  { %v461_v6 = vpop.f32.mrf.mxu1 }
 0x4af   :  { %576 = vrot.lane.b32.xlu0 %v461_v6, %s2574_s2 }
 0x4d1   :  { %v583_v17 = vpop.permute.xlu2 %582 }
 0x4d9   :  { %v569_v20 = vpop.permute.xlu2 %568 }
 0x4da   :  { %v589_v21 = vsel %vm170_vm8, %v261_v63, %v569_v20  ;;  %v748_v20 = vld [vmem:[%s2559_s13 + $0x18] sm:$0xff] }
 0x4f2   :  { %v575_v16 = vpop.permute.xlu1 %574 }
 0x4f3   :  { %v590_v18 = vsel %vm206_vm9, %v588_v14, %v575_v16  ;;  %v752_v16 = vld [vmem:[%s2559_s13 + $0x38] sm:$0xff] }
 0x4f4   :  { %v593_v19 = vsel %vm592_vm10, %v590_v18, %v583_v17  ;;  %772 = vmatpush.msra.mxu3 %v752_v16  ;;  %v751_v17 = vld [vmem:[%s2559_s13 + $0x30] sm:$0xff]  ;;  %v750_v18 = vld [vmem:[%s2559_s13 + $0x28] sm:$0xff] }
 0x4f5   :  { %1645 = vmatmul.msk.f32.vlgmr.msra.gmra.mxu0 %vm63_vm0, %v593_v19  ;;  %v749_v19 = vld [vmem:[%s2559_s13 + $0x20] sm:$0xff] }
 0x4f6   :  { %773 = vmatpush.msra.mxu3 %v751_v17 }
 0x4f8   :  { %774 = vmatpush.msra.mxu3 %v750_v18  ;;  %v1776_v18 = vld [vmem:[%s2561_s15] ss:$0 sm:$0xff] }
 0x4fa   :  { %v585_v23 = vpop.permute.xlu1 %584  ;;  %775 = vmatpush.msra.mxu3 %v749_v19 }
 0x4fc   :  { %776 = vmatpush.msra.mxu3 %v748_v20 }
 0x521   :  { %v577_v22 = vpop.permute.xlu0 %576 }
 0x522   :  { %v591_v24 = vsel %vm206_vm9, %v589_v21, %v577_v22  ;;  %v747_v21 = vld [vmem:[%s2559_s13 + $0x10] sm:$0xff]  ;;  %v746_v22 = vld [vmem:[%s2559_s13 + $0x8] sm:$0xff] }
 0x523   :  { %v594_v25 = vsel %vm592_vm10, %v591_v24, %v585_v23  ;;  %777 = vmatpush.msra.mxu3 %v747_v21  ;;  %v745_v23 = vld [vmem:[%s2559_s13] sm:$0xff] }
 0x524   :  { %1646 = vmatmul.msk.f32.gmra.mxu0 %vm63_vm0, %v594_v25  ;;  %v1774_v24 = vld [vmem:[%s2558_s12] ss:$0 sm:$0xff] }
 0x525   :  { %778 = vmatpush.msra.mxu3 %v746_v22  ;;  %v1777_v21 = vld [vmem:[%s2562_s16] ss:$0 sm:$0xff] }
 0x527   :  { %779 = vmatpush.msra.mxu3 %v745_v23 }
 0x572   :  { %v626_v28 = vpop.f32.mrf.mxu0 }
 0x573   :  { %v627_v27 = vadd.f32 %v1771_v26, %v626_v28 }
 0x575   :  { %v632_v29 = vadd.f32 %v627_v27, %v2051_v47 }
 0x577   :  { %v636_v30 = vsel %vm63_vm0, %v632_v29, 0.0 }
 0x578   :  { %637 = vadd.xlane.f32.xlu2 %v636_v30 }
 0x5a1   :  { %v629_v31 = vpop.f32.mrf.mxu0 }
 0x5a2   :  { %v630_v32 = vadd.f32 %v1771_v26, %v629_v31 }
 0x5a4   :  { %v633_v34 = vadd.f32 %v630_v32, %v2055_v52  ;;  %v693_v52 = vld [vmem:[%s2557_s11 + $0x18] sm:$0xff] }
 0x5a5   :  { %716 = vmatpush.msra.mxu1 %v693_v52 }
 0x5a6   :  { %v639_v35 = vsel %vm63_vm0, %v633_v34, 0.0 }
 0x5a7   :  { %640 = vadd.xlane.f32.xlu1 %v639_v35  ;;  %717 = vmatpush.msra.mxu1 %v692_v33 }
 0x5a9   :  { %718 = vmatpush.msra.mxu1 %v691_v45  ;;  %v1775_v45 = vld [vmem:[%s2560_s14] ss:$0 sm:$0xff] }
 0x5ab   :  { %719 = vmatpush.msra.mxu1 %v690_v46 }
 0x5eb   :  { %v638_v36 = vpop.xlane.xlu2 %637 }
 0x5ec   :  { %v642_v37 = vmul.f32 %v638_v36, %v2025_v10 }
 0x5ee   :  { %v644_v38 = vsub.f32 %v632_v29, %v642_v37 }
 0x5f0   :  { %v646_v39 = vmul.f32 %v644_v38, %v644_v38 }
 0x5f2   :  { %v648_v40 = vsel %vm63_vm0, %v646_v39, 0.0 }
 0x5f3   :  { %649 = vadd.xlane.f32.xlu0 %v648_v40 }
 0x61a   :  { %v641_v41 = vpop.xlane.xlu1 %640 }
 0x61b   :  { %v643_v47 = vmul.f32 %v641_v41, %v2025_v10 }
 0x61d   :  { %v645_v42 = vsub.f32 %v633_v34, %v643_v47 }
 0x61f   :  { %v647_v43 = vmul.f32 %v645_v42, %v645_v42 }
 0x621   :  { %v651_v44 = vsel %vm63_vm0, %v647_v43, 0.0 }
 0x622   :  { %652 = vadd.xlane.f32.xlu2 %v651_v44 }
 0x666   :  { %v650_v48 = vpop.xlane.xlu0 %649 }
 0x667   :  { %v654_v49 = vmul.f32 %v650_v48, %v2025_v10 }
 0x669   :  { %v656_v50 = vadd.f32 1e-12, %v654_v49 }
 0x66b   :  { %1824 = vrsqrt.f32 %v656_v50  ;;  %vm664_vm12 = vweird.f32 %v656_v50 }
 0x671   :  { %v1825_v51 = vpop.eup %1824 }
 0x672   :  { %v659_v53 = vmul.f32 %v1825_v51, %v656_v50  ;;  %vm665_vm11 = vweird.f32 %v1825_v51 }
 0x673   :  { %vm666_vm13 = vmor %vm664_vm12, %vm665_vm11 }
 0x674   :  { %v660_v54 = vmul.f32 %v1825_v51, %v659_v53 }
 0x676   :  { %v661_v55 = vmul.f32 0.5, %v660_v54 }
 0x678   :  { %v662_v56 = vsub.f32 1.5, %v661_v55 }
 0x67a   :  { %v663_v57 = vmul.f32 %v1825_v51, %v662_v56 }
 0x67c   :  { %v667_v59 = vsel %vm666_vm13, %v1825_v51, %v663_v57 }
 0x67d   :  { %v678_v60 = vmul.f32 %v667_v59, %v644_v38 }
 0x67f   :  { %v683_v63 = vmul.f32 %v1772_v58, %v678_v60 }
 0x681   :  { %v2238_v0 = vadd.f32 %v1773_v61, %v683_v63 }
 0x683   :  { %1647 = vmatmul.msk.f32.vlgmr.msra.gmra.mxu1 %vm63_vm0, %v2238_v0 }
 0x695   :  { %v653_v1 = vpop.xlane.xlu2 %652 }
 0x696   :  { %v655_v2 = vmul.f32 %v653_v1, %v2025_v10 }
 0x698   :  { %v657_v3 = vadd.f32 1e-12, %v655_v2 }
 0x69a   :  { %1826 = vrsqrt.f32 %v657_v3  ;;  %vm674_vm15 = vweird.f32 %v657_v3 }
 0x6a0   :  { %v1827_v4 = vpop.eup %1826 }
 0x6a1   :  { %v669_v62 = vmul.f32 %v1827_v4, %v657_v3  ;;  %vm675_vm14 = vweird.f32 %v1827_v4  ;;  %v1654_v3 = vld [vmem:[%s2551_s5 + $0x38] sm:$0xff] }
 0x6a2   :  { %vm676_vm1 = vmor %vm674_vm15, %vm675_vm14  ;;  %873 = vmatpush.msrb.mxu2 %v1654_v3 }
 0x6a3   :  { %v670_v5 = vmul.f32 %v1827_v4, %v669_v62  ;;  %v1652_v62 = vld [vmem:[%s2551_s5 + $0x28] sm:$0xff] }
 0x6a5   :  { %v671_v6 = vmul.f32 0.5, %v670_v5  ;;  %v1651_v5 = vld [vmem:[%s2551_s5 + $0x20] sm:$0xff] }
 0x6a7   :  { %v672_v7 = vsub.f32 1.5, %v671_v6 }
 0x6a9   :  { %v673_v8 = vmul.f32 %v1827_v4, %v672_v7 }
 0x6ab   :  { %v677_v11 = vsel %vm676_vm1, %v1827_v4, %v673_v8  ;;  %v1653_v4 = vld [vmem:[%s2551_s5 + $0x30] sm:$0xff] }
 0x6ac   :  { %v679_v12 = vmul.f32 %v677_v11, %v645_v42  ;;  %874 = vmatpush.msrb.mxu2 %v1653_v4 }
 0x6ae   :  { %v684_v13 = vmul.f32 %v1772_v58, %v679_v12  ;;  %875 = vmatpush.msrb.mxu2 %v1652_v62 }
 0x6b0   :  { %v689_v14 = vadd.f32 %v1773_v61, %v684_v13  ;;  %876 = vmatpush.msrb.mxu2 %v1651_v5 }
 0x6b2   :  { %1648 = vmatmul.msk.f32.gmra.mxu1 %vm63_vm0, %v689_v14 }
 0x700   :  { %v721_v25 = vpop.f32.mrf.mxu1 }
 0x701   :  { %v722_v26 = vadd.f32 %v1774_v24, %v721_v25 }
 0x703   :  { %v729_v28 = vmul.f32 0.044715, %v722_v26  ;;  %v727_v34 = vmul.f32 0.5, %v722_v26 }
 0x705   :  { %v731_v27 = vmul.f32 %v729_v28, %v722_v26 }
 0x707   :  { %v733_v29 = vmul.f32 %v731_v27, %v722_v26 }
 0x709   :  { %v735_v30 = vadd.f32 %v733_v29, %v722_v26 }
 0x70b   :  { %v737_v31 = vmul.f32 0.7978846, %v735_v30 }
 0x70d   :  { %1828 = vtanh.f32 %v737_v31 }
 0x713   :  { %v1829_v32 = vpop.eup %1828 }
 0x714   :  { %v741_v35 = vadd.f32 1.0, %v1829_v32 }
 0x716   :  { %v743_v36 = vmul.f32 %v741_v35, %v727_v34 }
 0x718   :  { %1649 = vmatmul.msk.f32.vlgmr.msra.gmra.mxu3 %vm757_vm2, %v743_v36 }
 0x72f   :  { %v724_v37 = vpop.f32.mrf.mxu1 }
 0x730   :  { %v725_v38 = vadd.f32 %v1774_v24, %v724_v37 }
 0x732   :  { %v730_v39 = vmul.f32 0.044715, %v725_v38  ;;  %v728_v44 = vmul.f32 0.5, %v725_v38 }
 0x734   :  { %v732_v40 = vmul.f32 %v730_v39, %v725_v38 }
 0x736   :  { %v734_v41 = vmul.f32 %v732_v40, %v725_v38 }
 0x738   :  { %v736_v47 = vadd.f32 %v734_v41, %v725_v38  ;;  %v1778_v38 = vld [vmem:[%s2552_s6 + $0x1] ss:$0 sm:$0xff]  ;;  %s2582_s6 = smov 56  }
 0x73a   :  { %v738_v42 = vmul.f32 0.7978846, %v736_v47 }
 0x73c   :  { %1830 = vtanh.f32 %v738_v42 }
 0x742   :  { %v1831_v43 = vpop.eup %1830 }
 0x743   :  { %v742_v52 = vadd.f32 1.0, %v1831_v43 }
 0x745   :  { %v744_v33 = vmul.f32 %v742_v52, %v728_v44 }
 0x747   :  { %1650 = vmatmul.msk.f32.gmra.mxu3 %vm757_vm2, %v744_v33 }
 0x79b   :  { %v781_v46 = vpop.f32.mrf.mxu3 }
 0x79c   :  { %v782_v48 = vadd.f32 %v1775_v45, %v781_v46 }
 0x79e   :  { %v787_v49 = vadd.f32 %v782_v48, %v2238_v0 }
 0x7a0   :  { %v791_v50 = vsel %vm63_vm0, %v787_v49, 0.0 }
 0x7a1   :  { %792 = vadd.xlane.f32.xlu1 %v791_v50 }
 0x7ca   :  { %v784_v51 = vpop.f32.mrf.mxu3 }
 0x7cb   :  { %v785_v53 = vadd.f32 %v1775_v45, %v784_v51 }
 0x7cd   :  { %v788_v54 = vadd.f32 %v785_v53, %v689_v14 }
 0x7cf   :  { %v794_v55 = vsel %vm63_vm0, %v788_v54, 0.0 }
 0x7d0   :  { %795 = vadd.xlane.f32.xlu2 %v794_v55 }
 0x814   :  { %v793_v56 = vpop.xlane.xlu1 %792 }
 0x815   :  { %v797_v57 = vmul.f32 %v793_v56, %v2025_v10 }
 0x817   :  { %v799_v58 = vsub.f32 %v787_v49, %v797_v57 }
 0x819   :  { %v801_v59 = vmul.f32 %v799_v58, %v799_v58 }
 0x81b   :  { %v803_v60 = vsel %vm63_vm0, %v801_v59, 0.0 }
 0x81c   :  { %804 = vadd.xlane.f32.xlu1 %v803_v60 }
 0x843   :  { %v796_v61 = vpop.xlane.xlu2 %795 }
 0x844   :  { %v798_v63 = vmul.f32 %v796_v61, %v2025_v10 }
 0x846   :  { %v800_v0 = vsub.f32 %v788_v54, %v798_v63 }
 0x848   :  { %v802_v1 = vmul.f32 %v800_v0, %v800_v0 }
 0x84a   :  { %v806_v2 = vsel %vm63_vm0, %v802_v1, 0.0 }
 0x84b   :  { %807 = vadd.xlane.f32.xlu0 %v806_v2 }
 0x88f   :  { %v805_v6 = vpop.xlane.xlu1 %804 }
 0x890   :  { %v809_v7 = vmul.f32 %v805_v6, %v2025_v10 }
 0x892   :  { %v811_v8 = vadd.f32 1e-12, %v809_v7 }
 0x894   :  { %1832 = vrsqrt.f32 %v811_v8  ;;  %vm819_vm4 = vweird.f32 %v811_v8 }
 0x89a   :  { %v1833_v11 = vpop.eup %1832 }
 0x89b   :  { %v814_v12 = vmul.f32 %v1833_v11, %v811_v8  ;;  %vm820_vm3 = vweird.f32 %v1833_v11 }
 0x89c   :  { %vm821_vm5 = vmor %vm819_vm4, %vm820_vm3 }
 0x89d   :  { %v815_v13 = vmul.f32 %v1833_v11, %v814_v12 }
 0x89f   :  { %v816_v14 = vmul.f32 0.5, %v815_v13 }
 0x8a1   :  { %v817_v16 = vsub.f32 1.5, %v816_v14 }
 0x8a3   :  { %v818_v17 = vmul.f32 %v1833_v11, %v817_v16 }
 0x8a5   :  { %v822_v19 = vsel %vm821_vm5, %v1833_v11, %v818_v17 }
 0x8a6   :  { %v833_v20 = vmul.f32 %v822_v19, %v799_v58 }
 0x8a8   :  { %v838_v22 = vmul.f32 %v1776_v18, %v833_v20 }
 0x8aa   :  { %v2302_v23 = vadd.f32 %v1777_v21, %v838_v22 }
 0x8ac   :  { %1656 = vmatmul.msk.f32.vlgmr.msrb.gmra.mxu2 %vm63_vm0, %v2302_v23 }
 0x8be   :  { %v808_v24 = vpop.xlane.xlu0 %807 }
 0x8bf   :  { %v810_v25 = vmul.f32 %v808_v24, %v2025_v10 }
 0x8c1   :  { %v812_v26 = vadd.f32 1e-12, %v810_v25 }
 0x8c3   :  { %1834 = vrsqrt.f32 %v812_v26  ;;  %vm829_vm7 = vweird.f32 %v812_v26 }
 0x8c9   :  { %v1835_v28 = vpop.eup %1834 }
 0x8ca   :  { %v824_v27 = vmul.f32 %v1835_v28, %v812_v26  ;;  %vm830_vm6 = vweird.f32 %v1835_v28 }
 0x8cb   :  { %vm831_vm11 = vmor %vm829_vm7, %vm830_vm6  ;;  %vm1597_vm7 = vcmask 254976  }
 0x8cc   :  { %v825_v29 = vmul.f32 %v1835_v28, %v824_v27 }
 0x8ce   :  { %v826_v30 = vmul.f32 0.5, %v825_v29 }
 0x8d0   :  { %v827_v31 = vsub.f32 1.5, %v826_v30 }
 0x8d2   :  { %v828_v32 = vmul.f32 %v1835_v28, %v827_v31 }
 0x8d4   :  { %v832_v34 = vsel %vm831_vm11, %v1835_v28, %v828_v32 }
 0x8d5   :  { %v834_v35 = vmul.f32 %v832_v34, %v800_v0 }
 0x8d7   :  { %v839_v36 = vmul.f32 %v1776_v18, %v834_v35 }
 0x8d9   :  { %v2307_v37 = vadd.f32 %v1777_v21, %v839_v36 }
 0x8db   :  { %1657 = vmatmul.msk.f32.gmra.mxu2 %vm63_vm0, %v2307_v37 }
 0x92f   :  { %v878_v39 = vpop.f32.mrf.mxu2 }
 0x930   :  { %v2314_v40 = vadd.f32 %v1778_v38, %v878_v39 }
 0x932   :  { %982 = vrot.lane.b32.xlu0 %v2314_v40, %s1912_s20  ;;  %986 = vrot.lane.b32.xlu1 %v2314_v40, %s1907_s29 }
 0x93a   :  { %886 = vrot.lane.b32.xlu0 %v2314_v40, %s1909_s0 }
 0x942   :  { %1186 = vrot.lane.b32.xlu0 %v2314_v40, %s1911_s1 }
 0x94a   :  { %1086 = vrot.lane.b32.xlu0 %v2314_v40, %s1908_s30 }
 0x95e   :  { %v881_v41 = vpop.f32.mrf.mxu2 }
 0x95f   :  { %v2326_v47 = vadd.f32 %v1778_v38, %v881_v41 }
 0x961   :  { %988 = vrot.lane.b32.xlu2 %v2326_v47, %s1907_s29  ;;  %1084 = vrot.lane.b32.xlu0 %v2326_v47, %s1910_s19  ;;  %v1748_v28 = vpack.i.bf16 %v2314_v40, %v2326_v47  ;;  %s2583_s29 = smov 64  }
 0x962   :  { %984 = vrot.lane.b32.xlu1 %v2326_v47, %s1912_s20  ;;  %s2588_s20 = smov 16  }
 0x969   :  { %888 = vrot.lane.b32.xlu2 %v2326_v47, %s1909_s0  ;;  %s2585_s0 = smov 48  }
 0x96a   :  { %1182 = vrot.lane.b32.xlu1 %v2314_v40, %s1913_s21 }
 0x971   :  { %1188 = vrot.lane.b32.xlu2 %v2326_v47, %s1911_s1  ;;  %s2587_s1 = smov 24  }
 0x972   :  { %1184 = vrot.lane.b32.xlu1 %v2326_v47, %s1913_s21  ;;  %s1921_s21 = smov [#allocation2]  }
 0x973   :  { %s1606_s28 = sshll.u32 %s1921_s21, 4  ;;  %s1607_s28 = int_to_ptr.vmem [resolvable:$true] %s1606_s28 }
 0x979   :  { %1088 = vrot.lane.b32.xlu2 %v2326_v47, %s1908_s30  ;;  %s2584_s30 = smov 40  }
 0x981   :  { %1082 = vrot.lane.b32.xlu2 %v2314_v40, %s1910_s19  ;;  %s2586_s19 = smov 8  }
 0x9a4   :  { %v983_v42 = vpop.permute.xlu0 %982  ;;  %v987_v44 = vpop.permute.xlu1 %986 }
 0x9ac   :  { %v887_v52 = vpop.permute.xlu0 %886 }
 0x9b4   :  { %v1187_v46 = vpop.permute.xlu0 %1186 }
 0x9bb   :  { %v989_v43 = vpop.permute.xlu2 %988 }
 0x9bc   :  { %1664 = vmatpush.xpose.msk.msrb.mxu3 %vm170_vm8, %v989_v43  ;;  %v1087_v50 = vpop.permute.xlu0 %1086 }
 0x9c0   :  { %1665 = vmatpush.xpose.msk.msrb.mxu3 %vm170_vm8, %v987_v44 }
 0x9c3   :  { %v889_v33 = vpop.permute.xlu2 %888  ;;  %1666 = vmatmul.msk.f32.vlgmr.msrb.gmra.mxu3 %vm170_vm8, %v983_v42 }
 0x9c4   :  { %1658 = vmatpush.xpose.msk.msrb.mxu0 %vm170_vm8, %v889_v33 }
 0x9c8   :  { %1659 = vmatpush.xpose.msk.msrb.mxu0 %vm170_vm8, %v887_v52 }
 0x9cb   :  { %v1189_v45 = vpop.permute.xlu2 %1188  ;;  %1660 = vmatmul.msk.f32.vlgmr.msrb.gmra.mxu0 %vm170_vm8, %v2314_v40 }
 0x9cc   :  { %1676 = vmatpush.xpose.msk.msra.mxu3 %vm170_vm8, %v1189_v45 }
 0x9d0   :  { %1677 = vmatpush.xpose.msk.msra.mxu3 %vm170_vm8, %v1187_v46 }
 0x9d3   :  { %v1089_v48 = vpop.permute.xlu2 %1088  ;;  %1661 = vmatmul.msk.f32.gmra.mxu0 %vm170_vm8, %v2326_v47  ;;  %v1085_v54 = vpop.permute.xlu0 %1084 }
 0x9d4   :  { %v985_v49 = vpop.permute.xlu1 %984  ;;  %1670 = vmatpush.xpose.msk.msra.mxu0 %vm170_vm8, %v1089_v48 }
 0x9d5   :  { %1667 = vmatmul.msk.f32.gmra.mxu3 %vm170_vm8, %v985_v49 }
 0x9d8   :  { %1671 = vmatpush.xpose.msk.msra.mxu0 %vm170_vm8, %v1087_v50 }
 0x9db   :  { %v1083_v51 = vpop.permute.xlu2 %1082 }
 0x9dc   :  { %v1183_v53 = vpop.permute.xlu1 %1182  ;;  %1672 = vmatmul.msk.f32.vlgmr.msra.gmra.mxu0 %vm170_vm8, %v1083_v51 }
 0x9dd   :  { %1678 = vmatmul.msk.f32.vlgmr.msra.gmra.mxu3 %vm170_vm8, %v1183_v53 }
 0x9e4   :  { %v1185_v55 = vpop.permute.xlu1 %1184  ;;  %1673 = vmatmul.msk.f32.gmra.mxu0 %vm170_vm8, %v1085_v54 }
 0x9e5   :  { %1679 = vmatmul.msk.f32.gmra.mxu3 %vm170_vm8, %v1185_v55 }
 0xa46   :  { %v1015_v56 = vpop.f32.mrf.mxu3 }
 0xa47   :  { %v1021_v57 = vmul.f32 0.35355338, %v1015_v56 }
 0xa48   :  { %v915_v58 = vpop.f32.mrf.mxu0 }
 0xa49   :  { %v921_v59 = vmul.f32 0.35355338, %v915_v58  ;;  %v1023_v60 = vadd.f32 %v1021_v57, %v2115_v9 }
 0xa4b   :  { %v1025_v61 = vsel %vm206_vm9, %v1023_v60, -inf  ;;  %v923_v63 = vadd.f32 %v921_v59, %v2115_v9 }
 0xa4c   :  { %1026 = vmax.xlane.f32.xlu1 %v1025_v61 }
 0xa4d   :  { %v925_v0 = vsel %vm206_vm9, %v923_v63, -inf }
 0xa4e   :  { %926 = vmax.xlane.f32.xlu2 %v925_v0 }
 0xa50   :  { %v918_v1 = vpop.f32.mrf.mxu0 }
 0xa51   :  { %v922_v2 = vmul.f32 0.35355338, %v918_v1 }
 0xa53   :  { %v924_v3 = vadd.f32 %v922_v2, %v2122_v15 }
 0xa55   :  { %v928_v4 = vsel %vm206_vm9, %v924_v3, -inf }
 0xa56   :  { %929 = vmax.xlane.f32.xlu1 %v928_v4 }
 0xa58   :  { %v1018_v62 = vpop.f32.mrf.mxu3 }
 0xa59   :  { %v1022_v5 = vmul.f32 0.35355338, %v1018_v62  ;;  %v1115_v6 = vpop.f32.mrf.mxu0 }
 0xa5a   :  { %v1121_v8 = vmul.f32 0.35355338, %v1115_v6 }
 0xa5b   :  { %v1024_v7 = vadd.f32 %v1022_v5, %v2122_v15 }
 0xa5c   :  { %v1123_v14 = vadd.f32 %v1121_v8, %v2115_v9 }
 0xa5d   :  { %v1028_v11 = vsel %vm206_vm9, %v1024_v7, -inf }
 0xa5e   :  { %1029 = vmax.xlane.f32.xlu0 %v1028_v11  ;;  %v1125_v19 = vsel %vm206_vm9, %v1123_v14, -inf }
 0xa60   :  { %v1215_v12 = vpop.f32.mrf.mxu3 }
 0xa61   :  { %v1221_v13 = vmul.f32 0.35355338, %v1215_v12  ;;  %v1118_v16 = vpop.f32.mrf.mxu0 }
 0xa62   :  { %v1122_v18 = vmul.f32 0.35355338, %v1118_v16 }
 0xa63   :  { %v2374_v17 = vadd.f32 %v1221_v13, %v2115_v9 }
 0xa64   :  { %v2380_v24 = vadd.f32 %v1122_v18, %v2122_v15 }
 0xa65   :  { %v1225_v20 = vsel %vm206_vm9, %v2374_v17, -inf }
 0xa66   :  { %1126 = vmax.xlane.f32.xlu0 %v1125_v19  ;;  %1226 = vmax.xlane.f32.xlu2 %v1225_v20  ;;  %v1128_v26 = vsel %vm206_vm9, %v2380_v24, -inf }
 0xa68   :  { %v1218_v21 = vpop.f32.mrf.mxu3 }
 0xa69   :  { %v1222_v22 = vmul.f32 0.35355338, %v1218_v21 }
 0xa6b   :  { %v1224_v25 = vadd.f32 %v1222_v22, %v2122_v15 }
 0xa6d   :  { %v1228_v9 = vsel %vm206_vm9, %v1224_v25, -inf }
 0xa6e   :  { %1129 = vmax.xlane.f32.xlu2 %v1128_v26  ;;  %1229 = vmax.xlane.f32.xlu1 %v1228_v9 }
 0xa86   :  { %1749 = vrot.lane.b32.xlu2 %v1748_v28, %s2582_s6 }
 0xabf   :  { %v1027_v27 = vpop.xlane.xlu1 %1026 }
 0xac0   :  { %v1031_v29 = vsub.f32 %v1023_v60, %v1027_v27 }
 0xac1   :  { %v927_v30 = vpop.xlane.xlu2 %926 }
 0xac2   :  { %v1033_v31 = vmul.f32 1.442695, %v1031_v29  ;;  %v931_v32 = vsub.f32 %v923_v63, %v927_v30 }
 0xac4   :  { %1836 = vpow2.f32 %v1033_v31  ;;  %v933_v34 = vmul.f32 1.442695, %v931_v32 }
 0xac6   :  { %1838 = vpow2.f32 %v933_v34 }
 0xac9   :  { %v930_v15 = vpop.xlane.xlu1 %929 }
 0xaca   :  { %v1837_v35 = vpop.eup %1836  ;;  %v932_v36 = vsub.f32 %v924_v3, %v930_v15 }
 0xacb   :  { %v1037_v38 = vsel %vm206_vm9, %v1837_v35, 0.0 }
 0xacc   :  { %v2390_v39 = vpop.eup %1838  ;;  %v935_v41 = vmul.f32 1.442695, %v932_v36  ;;  %1038 = vadd.xlane.f32.xlu0 %v1037_v38 }
 0xacd   :  { %v937_v40 = vsel %vm206_vm9, %v2390_v39, 0.0 }
 0xace   :  { %1840 = vpow2.f32 %v935_v41  ;;  %938 = vadd.xlane.f32.xlu1 %v937_v40 }
 0xad1   :  { %v1030_v47 = vpop.xlane.xlu0 %1029 }
 0xad2   :  { %v1032_v42 = vsub.f32 %v1024_v7, %v1030_v47 }
 0xad4   :  { %v2394_v43 = vpop.eup %1840  ;;  %v1035_v44 = vmul.f32 1.442695, %v1032_v42 }
 0xad5   :  { %v940_v52 = vsel %vm206_vm9, %v2394_v43, 0.0 }
 0xad6   :  { %1842 = vpow2.f32 %v1035_v44  ;;  %941 = vadd.xlane.f32.xlu0 %v940_v52 }
 0xad9   :  { %v1127_v33 = vpop.xlane.xlu0 %1126  ;;  %v1227_v45 = vpop.xlane.xlu2 %1226 }
 0xada   :  { %v1131_v46 = vsub.f32 %v1123_v14, %v1127_v33  ;;  %v1231_v61 = vsub.f32 %v2374_v17, %v1227_v45 }
 0xadc   :  { %v1843_v48 = vpop.eup %1842  ;;  %v1133_v49 = vmul.f32 1.442695, %v1131_v46  ;;  %v1233_v0 = vmul.f32 1.442695, %v1231_v61 }
 0xadd   :  { %v1040_v50 = vsel %vm206_vm9, %v1843_v48, 0.0 }
 0xade   :  { %1844 = vpow2.f32 %v1133_v49  ;;  %1041 = vadd.xlane.f32.xlu0 %v1040_v50  ;;  %v1685_v50 = vld [vmem:[%s2553_s7 + $0x38] sm:$0xff] }
 0xadf   :  { %1340 = vmatpush.msrb.mxu0 %v1685_v50 }
 0xae1   :  { %v1130_v51 = vpop.xlane.xlu2 %1129  ;;  %v1230_v58 = vpop.xlane.xlu1 %1229 }
 0xae2   :  { %v1232_v59 = vsub.f32 %v1224_v25, %v1230_v58  ;;  %v1132_v6 = vsub.f32 %v2380_v24, %v1130_v51  ;;  %v1684_v51 = vld [vmem:[%s2553_s7 + $0x30] sm:$0xff] }
 0xae3   :  { %1341 = vmatpush.msrb.mxu0 %v1684_v51 }
 0xae4   :  { %v2399_v53 = vpop.eup %1844  ;;  %v1235_v60 = vmul.f32 1.442695, %v1232_v59  ;;  %v1135_v8 = vmul.f32 1.442695, %v1132_v6 }
 0xae5   :  { %v1137_v54 = vsel %vm206_vm9, %v2399_v53, 0.0 }
 0xae6   :  { %1138 = vadd.xlane.f32.xlu2 %v1137_v54  ;;  %1846 = vpow2.f32 %v1235_v60  ;;  %v1682_v54 = vld [vmem:[%s2553_s7 + $0x20] sm:$0xff] }
 0xae7   :  { %1754 = vrot.lane.b32.xlu1 %v1748_v28, %s2583_s29  ;;  %1848 = vpow2.f32 %v1233_v0 }
 0xae9   :  { %v1750_v55 = vpop.permute.xlu2 %1749 }
 0xaea   :  { %v1751_v56 = vunpack.i.l.bf16 %v1750_v55  ;;  %v1752_v57 = vunpack.i.h.bf16 %v1750_v55 }
 0xaec   :  { %1073 = vmatpush.msra.mxu2 %v1751_v56  ;;  %v1847_v63 = vpop.eup %1846 }
 0xaed   :  { %v1240_v1 = vsel %vm206_vm9, %v1847_v63, 0.0  ;;  %v1849_v2 = vpop.eup %1848 }
 0xaee   :  { %1074 = vmatpush.msra.mxu2 %v1752_v57  ;;  %v1237_v3 = vsel %vm206_vm9, %v1849_v2, 0.0 }
 0xaf2   :  { %1759 = vrot.lane.b32.xlu0 %v1748_v28, %s2584_s30 }
 0xb11   :  { %1241 = vadd.xlane.f32.xlu1 %v1240_v1 }
 0xb1c   :  { %1238 = vadd.xlane.f32.xlu0 %v1237_v3 }
 0xb30   :  { %1764 = vrot.lane.b32.xlu0 %v1748_v28, %s2585_s0 }
 0xb3f   :  { %v1039_v4 = vpop.xlane.xlu0 %1038 }
 0xb40   :  { %1850 = vrcp.f32 %v1039_v4  ;;  %v1779_v4 = vld [vmem:[%s2554_s8 + $0x1] ss:$0 sm:$0xff] }
 0xb41   :  { %1852 = vpow2.f32 %v1135_v8  ;;  %v939_v11 = vpop.xlane.xlu1 %938 }
 0xb46   :  { %v1851_v62 = vpop.eup %1850 }
 0xb47   :  { %v1045_v5 = vmul.f32 %v1851_v62, %v1837_v35  ;;  %v1853_v13 = vpop.eup %1852 }
 0xb48   :  { %v1140_v17 = vsel %vm206_vm9, %v1853_v13, 0.0 }
 0xb49   :  { %1668 = vmatmul.msk.f32.vlgmr.msra.gmra.mxu2 %vm206_vm9, %v1045_v5  ;;  %v942_v7 = vpop.xlane.xlu0 %941 }
 0xb51   :  { %v1042_v12 = vpop.xlane.xlu0 %1041 }
 0xb52   :  { %1854 = vrcp.f32 %v1042_v12 }
 0xb53   :  { %1856 = vrcp.f32 %v939_v11 }
 0xb54   :  { %1858 = vrcp.f32 %v942_v7 }
 0xb58   :  { %v1855_v14 = vpop.eup %1854 }
 0xb59   :  { %v1755_v16 = vpop.permute.xlu1 %1754  ;;  %v1046_v18 = vmul.f32 %v1855_v14, %v1843_v48  ;;  %v1857_v19 = vpop.eup %1856 }
 0xb5a   :  { %v1756_v20 = vunpack.i.l.bf16 %v1755_v16  ;;  %1141 = vadd.xlane.f32.xlu0 %v1140_v17  ;;  %v1757_v21 = vunpack.i.h.bf16 %v1755_v16  ;;  %v945_v22 = vmul.f32 %v1857_v19, %v2390_v39  ;;  %v1859_v24 = vpop.eup %1858  ;;  %v1139_v32 = vpop.xlane.xlu2 %1138 }
 0xb5b   :  { %1669 = vmatmul.msk.f32.gmra.mxu2 %vm206_vm9, %v1046_v18  ;;  %v946_v9 = vmul.f32 %v1859_v24, %v2394_v43 }
 0xb5c   :  { %973 = vmatpush.msrb.mxu1 %v1756_v20 }
 0xb5e   :  { %974 = vmatpush.msrb.mxu1 %v1757_v21 }
 0xb5f   :  { %1662 = vmatmul.msk.f32.vlgmr.msrb.gmra.mxu1 %vm206_vm9, %v945_v22 }
 0xb64   :  { %v1760_v25 = vpop.permute.xlu0 %1759 }
 0xb65   :  { %v1761_v26 = vunpack.i.l.bf16 %v1760_v25  ;;  %v1762_v28 = vunpack.i.h.bf16 %v1760_v25  ;;  %v1693_v25 = vld [vmem:[%s2557_s11 + $0x30] sm:$0xff] }
 0xb67   :  { %1663 = vmatmul.msk.f32.gmra.mxu1 %vm206_vm9, %v946_v9  ;;  %1273 = vmatpush.msrb.mxu2 %v1761_v26  ;;  %v1692_v26 = vld [vmem:[%s2557_s11 + $0x28] sm:$0xff]  ;;  %v1691_v9 = vld [vmem:[%s2557_s11 + $0x20] sm:$0xff] }
 0xb69   :  { %1274 = vmatpush.msrb.mxu2 %v1762_v28 }
 0xb84   :  { %v1242_v29 = vpop.xlane.xlu1 %1241 }
 0xb8f   :  { %v1239_v27 = vpop.xlane.xlu0 %1238 }
 0xb90   :  { %1860 = vrcp.f32 %v1239_v27 }
 0xb91   :  { %1862 = vrcp.f32 %v1242_v29 }
 0xb92   :  { %1864 = vrcp.f32 %v1139_v32 }
 0xb96   :  { %v1861_v30 = vpop.eup %1860 }
 0xb97   :  { %v1245_v31 = vmul.f32 %v1861_v30, %v1849_v2  ;;  %v1863_v34 = vpop.eup %1862 }
 0xb98   :  { %v1246_v15 = vmul.f32 %v1863_v34, %v1847_v63  ;;  %v1865_v36 = vpop.eup %1864 }
 0xb99   :  { %1680 = vmatmul.msk.f32.vlgmr.msrb.gmra.mxu2 %vm206_vm9, %v1245_v31  ;;  %v1145_v41 = vmul.f32 %v1865_v36, %v2399_v53  ;;  %v1683_v53 = vld [vmem:[%s2553_s7 + $0x28] sm:$0xff]  ;;  %v1780_v36 = vld [vmem:[%s2555_s9 + $0x1] ss:$0 sm:$0xff] }
 0xb9a   :  { %1342 = vmatpush.msrb.mxu0 %v1683_v53 }
 0xb9c   :  { %1343 = vmatpush.msrb.mxu0 %v1682_v54 }
 0xba1   :  { %1681 = vmatmul.msk.f32.gmra.mxu2 %vm206_vm9, %v1246_v15 }
 0xba2   :  { %v1765_v35 = vpop.permute.xlu0 %1764 }
 0xba3   :  { %v1766_v38 = vunpack.i.l.bf16 %v1765_v35  ;;  %v1767_v39 = vunpack.i.h.bf16 %v1765_v35 }
 0xba5   :  { %1173 = vmatpush.msra.mxu1 %v1766_v38 }
 0xba7   :  { %1174 = vmatpush.msra.mxu1 %v1767_v39 }
 0xba8   :  { %1674 = vmatmul.msk.f32.vlgmr.msra.gmra.mxu1 %vm206_vm9, %v1145_v41  ;;  %v1781_v41 = vld [vmem:[%s2556_s10 + $0x1] ss:$0 sm:$0xff]  ;;  %s2589_s10 = sld [smem:[#allocation7_spill]] }
 0xbcc   :  { %v1076_v40 = vpop.f32.mrf.mxu2 }
 0xbcd   :  { %1284 = vrot.lane.b32.xlu2 %v1076_v40, %s2586_s19  ;;  %v1142_v47 = vpop.xlane.xlu0 %1141 }
 0xbce   :  { %1866 = vrcp.f32 %v1142_v47 }
 0xbd4   :  { %v1867_v42 = vpop.eup %1866 }
 0xbd5   :  { %v1146_v43 = vmul.f32 %v1867_v42, %v1853_v13 }
 0xbd7   :  { %1675 = vmatmul.msk.f32.gmra.mxu1 %vm206_vm9, %v1146_v43 }
 0xbdc   :  { %v976_v44 = vpop.f32.mrf.mxu1 }
 0xbde   :  { %v1079_v52 = vpop.f32.mrf.mxu2 }
 0xbe4   :  { %v979_v45 = vpop.f32.mrf.mxu1 }
 0xc1c   :  { %v1276_v33 = vpop.f32.mrf.mxu2 }
 0xc1d   :  { %1300 = vrot.lane.b32.xlu2 %v1276_v33, %s2587_s1 }
 0xc24   :  { %v1279_v48 = vpop.f32.mrf.mxu2 }
 0xc25   :  { %1286 = vrot.lane.b32.xlu2 %v1079_v52, %s2586_s19  ;;  %v1176_v46 = vpop.f32.mrf.mxu1 }
 0xc26   :  { %1292 = vrot.lane.b32.xlu1 %v1176_v46, %s2588_s20 }
 0xc27   :  { %v1285_v55 = vpop.permute.xlu2 %1284 }
 0xc28   :  { %v1306_v56 = vsel %vm170_vm8, %v976_v44, %v1285_v55  ;;  %v1705_v55 = vld [vmem:[%s2559_s13 + $0x78] sm:$0xff] }
 0xc29   :  { %1496 = vmatpush.msrb.mxu3 %v1705_v55 }
 0xc2e   :  { %1302 = vrot.lane.b32.xlu1 %v1279_v48, %s2587_s1 }
 0xc54   :  { %v1179_v49 = vpop.f32.mrf.mxu1 }
 0xc55   :  { %1294 = vrot.lane.b32.xlu0 %v1179_v49, %s2588_s20 }
 0xc77   :  { %v1301_v58 = vpop.permute.xlu2 %1300 }
 0xc7f   :  { %v1287_v61 = vpop.permute.xlu2 %1286 }
 0xc80   :  { %v1307_v63 = vsel %vm170_vm8, %v979_v45, %v1287_v61  ;;  %v1699_v61 = vld [vmem:[%s2559_s13 + $0x48] sm:$0xff] }
 0xc98   :  { %v1293_v57 = vpop.permute.xlu1 %1292 }
 0xc99   :  { %v1308_v59 = vsel %vm206_vm9, %v1306_v56, %v1293_v57  ;;  %v1704_v56 = vld [vmem:[%s2559_s13 + $0x70] sm:$0xff]  ;;  %v1703_v57 = vld [vmem:[%s2559_s13 + $0x68] sm:$0xff] }
 0xc9a   :  { %v1310_v60 = vsel %vm592_vm10, %v1308_v59, %v1301_v58  ;;  %1497 = vmatpush.msrb.mxu3 %v1704_v56  ;;  %v1702_v58 = vld [vmem:[%s2559_s13 + $0x60] sm:$0xff]  ;;  %v1701_v59 = vld [vmem:[%s2559_s13 + $0x58] sm:$0xff] }
 0xc9b   :  { %1687 = vmatmul.msk.f32.vlgmr.msrb.gmra.mxu0 %vm63_vm0, %v1310_v60  ;;  %v1700_v60 = vld [vmem:[%s2559_s13 + $0x50] sm:$0xff] }
 0xc9c   :  { %1498 = vmatpush.msrb.mxu3 %v1703_v57 }
 0xc9e   :  { %1499 = vmatpush.msrb.mxu3 %v1702_v58 }
 0xca0   :  { %v1303_v1 = vpop.permute.xlu1 %1302  ;;  %1500 = vmatpush.msrb.mxu3 %v1701_v59 }
 0xca2   :  { %1501 = vmatpush.msrb.mxu3 %v1700_v60 }
 0xca4   :  { %1502 = vmatpush.msrb.mxu3 %v1699_v61 }
 0xcc7   :  { %v1295_v0 = vpop.permute.xlu0 %1294 }
 0xcc8   :  { %v1309_v2 = vsel %vm206_vm9, %v1307_v63, %v1295_v0  ;;  %v1698_v63 = vld [vmem:[%s2559_s13 + $0x40] sm:$0xff] }
 0xcc9   :  { %v1311_v3 = vsel %vm592_vm10, %v1309_v2, %v1303_v1  ;;  %1503 = vmatpush.msrb.mxu3 %v1698_v63  ;;  %v1782_v0 = vld [vmem:[%s2558_s12 + $0x1] ss:$0 sm:$0xff] }
 0xcca   :  { %1688 = vmatmul.msk.f32.gmra.mxu0 %vm63_vm0, %v1311_v3 }
 0xd18   :  { %v1345_v62 = vpop.f32.mrf.mxu0 }
 0xd19   :  { %v1346_v5 = vadd.f32 %v1779_v4, %v1345_v62 }
 0xd1b   :  { %v1351_v6 = vadd.f32 %v1346_v5, %v2302_v23 }
 0xd1d   :  { %v1357_v7 = vsel %vm63_vm0, %v1351_v6, 0.0 }
 0xd1e   :  { %1358 = vadd.xlane.f32.xlu2 %v1357_v7 }
 0xd47   :  { %v1348_v8 = vpop.f32.mrf.mxu0 }
 0xd48   :  { %v1349_v11 = vadd.f32 %v1779_v4, %v1348_v8 }
 0xd4a   :  { %v1352_v12 = vadd.f32 %v1349_v11, %v2307_v37  ;;  %v1694_v37 = vld [vmem:[%s2557_s11 + $0x38] sm:$0xff] }
 0xd4b   :  { %1439 = vmatpush.msrb.mxu1 %v1694_v37  ;;  %v1783_v37 = vld [vmem:[%s2560_s14 + $0x1] ss:$0 sm:$0xff] }
 0xd4c   :  { %v1360_v13 = vsel %vm63_vm0, %v1352_v12, 0.0 }
 0xd4d   :  { %1361 = vadd.xlane.f32.xlu1 %v1360_v13  ;;  %1440 = vmatpush.msrb.mxu1 %v1693_v25 }
 0xd4f   :  { %1441 = vmatpush.msrb.mxu1 %v1692_v26 }
 0xd51   :  { %1442 = vmatpush.msrb.mxu1 %v1691_v9 }
 0xd91   :  { %v1359_v14 = vpop.xlane.xlu2 %1358 }
 0xd92   :  { %v1363_v16 = vmul.f32 %v1359_v14, %v2025_v10 }
 0xd94   :  { %v1365_v17 = vsub.f32 %v1351_v6, %v1363_v16 }
 0xd96   :  { %v1367_v18 = vmul.f32 %v1365_v17, %v1365_v17 }
 0xd98   :  { %v1369_v19 = vsel %vm63_vm0, %v1367_v18, 0.0 }
 0xd99   :  { %1370 = vadd.xlane.f32.xlu0 %v1369_v19 }
 0xdc0   :  { %v1362_v20 = vpop.xlane.xlu1 %1361 }
 0xdc1   :  { %v1364_v23 = vmul.f32 %v1362_v20, %v2025_v10 }
 0xdc3   :  { %v1366_v21 = vsub.f32 %v1352_v12, %v1364_v23 }
 0xdc5   :  { %v1368_v22 = vmul.f32 %v1366_v21, %v1366_v21 }
 0xdc7   :  { %v1372_v24 = vsel %vm63_vm0, %v1368_v22, 0.0 }
 0xdc8   :  { %1373 = vadd.xlane.f32.xlu2 %v1372_v24 }
 0xe0c   :  { %v1371_v28 = vpop.xlane.xlu0 %1370 }
 0xe0d   :  { %v1375_v27 = vmul.f32 %v1371_v28, %v2025_v10 }
 0xe0f   :  { %v1377_v29 = vadd.f32 1e-12, %v1375_v27 }
 0xe11   :  { %1868 = vrsqrt.f32 %v1377_v29  ;;  %vm1385_vm10 = vweird.f32 %v1377_v29 }
 0xe17   :  { %v1869_v30 = vpop.eup %1868 }
 0xe18   :  { %v1380_v31 = vmul.f32 %v1869_v30, %v1377_v29  ;;  %vm1386_vm8 = vweird.f32 %v1869_v30 }
 0xe19   :  { %vm1387_vm12 = vmor %vm1385_vm10, %vm1386_vm8 }
 0xe1a   :  { %v1381_v32 = vmul.f32 %v1869_v30, %v1380_v31 }
 0xe1c   :  { %v1382_v34 = vmul.f32 0.5, %v1381_v32 }
 0xe1e   :  { %v1383_v15 = vsub.f32 1.5, %v1382_v34 }
 0xe20   :  { %v1384_v35 = vmul.f32 %v1869_v30, %v1383_v15 }
 0xe22   :  { %v1388_v38 = vsel %vm1387_vm12, %v1869_v30, %v1384_v35 }
 0xe23   :  { %v1399_v39 = vmul.f32 %v1388_v38, %v1365_v17 }
 0xe25   :  { %v1404_v40 = vmul.f32 %v1780_v36, %v1399_v39 }
 0xe27   :  { %v2478_v47 = vadd.f32 %v1781_v41, %v1404_v40 }
 0xe29   :  { %1696 = vmatmul.msk.f32.vlgmr.msrb.gmra.mxu1 %vm63_vm0, %v2478_v47 }
 0xe3b   :  { %v1374_v42 = vpop.xlane.xlu2 %1373 }
 0xe3c   :  { %v1376_v43 = vmul.f32 %v1374_v42, %v2025_v10 }
 0xe3e   :  { %v1378_v44 = vadd.f32 1e-12, %v1376_v43 }
 0xe40   :  { %1870 = vrsqrt.f32 %v1378_v44  ;;  %vm1395_vm14 = vweird.f32 %v1378_v44 }
 0xe46   :  { %v1871_v52 = vpop.eup %1870 }
 0xe47   :  { %v1390_v33 = vmul.f32 %v1871_v52, %v1378_v44  ;;  %vm1396_vm13 = vweird.f32 %v1871_v52 }
 0xe48   :  { %vm1397_vm15 = vmor %vm1395_vm14, %vm1396_vm13 }
 0xe49   :  { %v1391_v45 = vmul.f32 %v1871_v52, %v1390_v33 }
 0xe4b   :  { %v1392_v46 = vmul.f32 0.5, %v1391_v45 }
 0xe4d   :  { %v1393_v48 = vsub.f32 1.5, %v1392_v46 }
 0xe4f   :  { %v1394_v49 = vmul.f32 %v1871_v52, %v1393_v48 }
 0xe51   :  { %v1398_v50 = vsel %vm1397_vm15, %v1871_v52, %v1394_v49 }
 0xe52   :  { %v1400_v51 = vmul.f32 %v1398_v50, %v1366_v21  ;;  %v1784_v50 = vld [vmem:[%s2561_s15 + $0x1] ss:$0 sm:$0xff] }
 0xe54   :  { %v1405_v53 = vmul.f32 %v1780_v36, %v1400_v51 }
 0xe56   :  { %v1410_v54 = vadd.f32 %v1781_v41, %v1405_v53  ;;  %v1785_v53 = vld [vmem:[%s2562_s16 + $0x1] ss:$0 sm:$0xff] }
 0xe58   :  { %1697 = vmatmul.msk.f32.gmra.mxu1 %vm63_vm0, %v1410_v54 }
 0xea6   :  { %v1444_v1 = vpop.f32.mrf.mxu1 }
 0xea7   :  { %v1445_v2 = vadd.f32 %v1782_v0, %v1444_v1 }
 0xea9   :  { %v1452_v3 = vmul.f32 0.044715, %v1445_v2  ;;  %v1450_v8 = vmul.f32 0.5, %v1445_v2 }
 0xeab   :  { %v1454_v4 = vmul.f32 %v1452_v3, %v1445_v2 }
 0xead   :  { %v1456_v62 = vmul.f32 %v1454_v4, %v1445_v2 }
 0xeaf   :  { %v1458_v5 = vadd.f32 %v1456_v62, %v1445_v2 }
 0xeb1   :  { %v1460_v6 = vmul.f32 0.7978846, %v1458_v5 }
 0xeb3   :  { %1872 = vtanh.f32 %v1460_v6 }
 0xeb9   :  { %v1873_v7 = vpop.eup %1872 }
 0xeba   :  { %v1464_v11 = vadd.f32 1.0, %v1873_v7 }
 0xebc   :  { %v1466_v12 = vmul.f32 %v1464_v11, %v1450_v8 }
 0xebe   :  { %1707 = vmatmul.msk.f32.vlgmr.msrb.gmra.mxu3 %vm757_vm2, %v1466_v12 }
 0xed5   :  { %v1447_v13 = vpop.f32.mrf.mxu1 }
 0xed6   :  { %v1448_v14 = vadd.f32 %v1782_v0, %v1447_v13 }
 0xed8   :  { %v1453_v16 = vmul.f32 0.044715, %v1448_v14  ;;  %v1451_v21 = vmul.f32 0.5, %v1448_v14 }
 0xeda   :  { %v1455_v17 = vmul.f32 %v1453_v16, %v1448_v14 }
 0xedc   :  { %v1457_v18 = vmul.f32 %v1455_v17, %v1448_v14 }
 0xede   :  { %v1459_v19 = vadd.f32 %v1457_v18, %v1448_v14 }
 0xee0   :  { %v1461_v20 = vmul.f32 0.7978846, %v1459_v19 }
 0xee2   :  { %1874 = vtanh.f32 %v1461_v20 }
 0xee8   :  { %v1875_v23 = vpop.eup %1874 }
 0xee9   :  { %v1465_v22 = vadd.f32 1.0, %v1875_v23 }
 0xeeb   :  { %v1467_v24 = vmul.f32 %v1465_v22, %v1451_v21 }
 0xeed   :  { %1708 = vmatmul.msk.f32.gmra.mxu3 %vm757_vm2, %v1467_v24 }
 0xf41   :  { %v1505_v25 = vpop.f32.mrf.mxu3 }
 0xf42   :  { %v1506_v26 = vadd.f32 %v1783_v37, %v1505_v25 }
 0xf44   :  { %v1511_v9 = vadd.f32 %v1506_v26, %v2478_v47 }
 0xf46   :  { %v1517_v28 = vsel %vm63_vm0, %v1511_v9, 0.0 }
 0xf47   :  { %1518 = vadd.xlane.f32.xlu2 %v1517_v28 }
 0xf70   :  { %v1508_v27 = vpop.f32.mrf.mxu3 }
 0xf71   :  { %v1509_v29 = vadd.f32 %v1783_v37, %v1508_v27 }
 0xf73   :  { %v1512_v30 = vadd.f32 %v1509_v29, %v1410_v54 }
 0xf75   :  { %v1520_v31 = vsel %vm63_vm0, %v1512_v30, 0.0 }
 0xf76   :  { %1521 = vadd.xlane.f32.xlu1 %v1520_v31 }
 0xfba   :  { %v1519_v32 = vpop.xlane.xlu2 %1518 }
 0xfbb   :  { %v1523_v34 = vmul.f32 %v1519_v32, %v2025_v10 }
 0xfbd   :  { %v1525_v15 = vsub.f32 %v1511_v9, %v1523_v34 }
 0xfbf   :  { %v1527_v35 = vmul.f32 %v1525_v15, %v1525_v15 }
 0xfc1   :  { %v1529_v36 = vsel %vm63_vm0, %v1527_v35, 0.0 }
 0xfc2   :  { %1530 = vadd.xlane.f32.xlu0 %v1529_v36 }
 0xfe9   :  { %v1522_v38 = vpop.xlane.xlu1 %1521 }
 0xfea   :  { %v1524_v39 = vmul.f32 %v1522_v38, %v2025_v10 }
 0xfec   :  { %v1526_v41 = vsub.f32 %v1512_v30, %v1524_v39 }
 0xfee   :  { %v1528_v40 = vmul.f32 %v1526_v41, %v1526_v41 }
 0xff0   :  { %v1532_v47 = vsel %vm63_vm0, %v1528_v40, 0.0 }
 0xff1   :  { %1533 = vadd.xlane.f32.xlu1 %v1532_v47 }
0x1035   :  { %v1531_v42 = vpop.xlane.xlu0 %1530 }
0x1036   :  { %v1535_v43 = vmul.f32 %v1531_v42, %v2025_v10 }
0x1038   :  { %v1537_v44 = vadd.f32 1e-12, %v1535_v43 }
0x103a   :  { %1876 = vrsqrt.f32 %v1537_v44  ;;  %vm1545_vm2 = vweird.f32 %v1537_v44 }
0x1040   :  { %v1877_v52 = vpop.eup %1876 }
0x1041   :  { %v1540_v33 = vmul.f32 %v1877_v52, %v1537_v44  ;;  %vm1546_vm1 = vweird.f32 %v1877_v52 }
0x1042   :  { %vm1547_vm3 = vmor %vm1545_vm2, %vm1546_vm1 }
0x1043   :  { %v1541_v45 = vmul.f32 %v1877_v52, %v1540_v33 }
0x1045   :  { %v1542_v46 = vmul.f32 0.5, %v1541_v45 }
0x1047   :  { %v1543_v48 = vsub.f32 1.5, %v1542_v46 }
0x1049   :  { %v1544_v49 = vmul.f32 %v1877_v52, %v1543_v48 }
0x104b   :  { %v1548_v51 = vsel %vm1547_vm3, %v1877_v52, %v1544_v49 }
0x104c   :  { %v1559_v54 = vmul.f32 %v1548_v51, %v1525_v15 }
0x104e   :  { %v1564_v55 = vmul.f32 %v1784_v50, %v1559_v54 }
0x1050   :  { %v1569_v56 = vadd.f32 %v1785_v53, %v1564_v55 }
0x1052   :  { %1571 = vst.msk [vmem:[%s2563_s17] sm:$0xff] %vm63_vm0, %v1569_v56 }
0x1064   :  { %v1534_v57 = vpop.xlane.xlu1 %1533 }
0x1065   :  { %v1536_v58 = vmul.f32 %v1534_v57, %v2025_v10  ;;  %v1573_v10 = vld [vmem:[%s2589_s10] sm:$0x3] }
0x1067   :  { %v1538_v59 = vadd.f32 1e-12, %v1536_v58 }
0x1069   :  { %1878 = vrsqrt.f32 %v1538_v59  ;;  %vm1555_vm5 = vweird.f32 %v1538_v59 }
0x106f   :  { %v1879_v60 = vpop.eup %1878 }
0x1070   :  { %v1550_v61 = vmul.f32 %v1879_v60, %v1538_v59  ;;  %vm1556_vm4 = vweird.f32 %v1879_v60 }
0x1071   :  { %vm1557_vm6 = vmor %vm1555_vm5, %vm1556_vm4 }
0x1072   :  { %v1551_v63 = vmul.f32 %v1879_v60, %v1550_v61 }
0x1074   :  { %v1552_v0 = vmul.f32 0.5, %v1551_v63 }
0x1076   :  { %v1553_v1 = vsub.f32 1.5, %v1552_v0 }
0x1078   :  { %v1554_v2 = vmul.f32 %v1879_v60, %v1553_v1 }
0x107a   :  { %v1558_v3 = vsel %vm1557_vm6, %v1879_v60, %v1554_v2 }
0x107b   :  { %v1560_v4 = vmul.f32 %v1558_v3, %v1526_v41 }
0x107d   :  { %v1565_v62 = vmul.f32 %v1784_v50, %v1560_v4 }
0x107f   :  { %v1570_v5 = vadd.f32 %v1785_v53, %v1565_v62 }
0x1081   :  { %1572 = vst.msk [vmem:[%s2563_s17 + $0x8] sm:$0xff] %vm63_vm0, %v1570_v5  ;;  %1591 = vmatpush.msra.mxu2 %v1570_v5 }
0x1083   :  { %1592 = vmatpush.msra.mxu2 %v1569_v56 }
0x1084   :  { %1711 = vmatmul.msk.f32.vlgmr.msra.gmra.mxu2 %vm206_vm9, %v1573_v10 }
0x1107   :  { %v1594_v6 = vpop.f32.mrf.mxu2 }
0x1108   :  { %1598 = vst.msk [vmem:[#allocation2] sm:$0x3] %vm1597_vm7, %v1594_v6 }
0x1109   :  { %1611 = dma.vmem_to_hbm [thread:$0]  %s1607_s28, 32, %s1609_s22, [#allocation3]  }
0x110a   :  { %1904 = dma.done.wait [#allocation3], 32  }
0x110b   :  { %1905 = vsyncadd [#allocation3], 4294967264 }
0x110c   :  { %1618 = vsyncpa [#allocation3], 1 }

</bundles_post_ra>
